<compile_context>
chip_gen: v7x
topology: tpu7x:2x2x1
jax: 0.10.0
libtpu: 0.0.40
codegen_flags: <defaults>
</compile_context>

<pallas_src>
import jax
import jax.numpy as jnp
from jax import lax
from jax.experimental import pallas as pl
from jax.experimental.pallas import tpu as pltpu


def lstm_classifier_kernel(ids_ref, t_ref, whh_ref, wl_ref, bl_ref, out_ref,
                           h_sc, c_sc, xg_sc):
    """ids_ref: (B_pad, S)  int32 token ids in SMEM (scalar prefetch), batch-major
       t_ref:   (V, LP)     f32  fused table emb @ W_ih^T + (b_ih + b_hh),
                                 gates packed densely (i|f|g|o) in first 4*H lanes
       whh_ref: (H, LP)     f32  W_hh^T, same dense gate packing
       wl_ref:  (H, C)      f32  W_linear^T
       bl_ref:  (1, C)      f32  b_linear
       out_ref: (TB, C)     f32  softmax probabilities for this batch block
       h_sc/c_sc: (TB, H)   f32  recurrent state scratch
       xg_sc:   (S, TB, LP) f32  gathered input projection (bias already folded in)
    """
    S, TB, LP = xg_sc.shape
    H = h_sc.shape[1]
    base = pl.program_id(0) * TB

    # --- Gather fused rows (embedding lookup + x @ W_ih^T + bias, all folded into
    #     the host-side table) into a sublane-aligned (S, TB, LP) layout.
    #     Static Python loops: only the table row index is dynamic.
    # TODO(synk): for large vocab keep T in HBM (memory_space=pl.ANY) and
    # DMA-gather rows (double-buffered) instead of a full VMEM-resident BlockSpec.
    for t in range(S):
        for b in range(TB):
            tok = ids_ref[base + b, t]
            xg_sc[t, pl.ds(b, 1), :] = t_ref[pl.ds(tok, 1), :]

    h_sc[...] = jnp.zeros_like(h_sc)
    c_sc[...] = jnp.zeros_like(c_sc)

    # Lane mask selecting the g-gate block (tanh); all other gate lanes use sigmoid.
    lane = lax.broadcasted_iota(jnp.int32, (TB, LP), 1)
    g_mask = (lane >= 2 * H) & (lane < 3 * H)

    def step(t, carry):
        # Only this (TB,H)@(H,4H) recurrent matmul sits on the serial critical path.
        gates = xg_sc[t] + jnp.dot(h_sc[...], whh_ref[...],
                                   preferred_element_type=jnp.float32)
        # One sigmoid + one tanh EUP pass over the whole dense gate block.
        act = jnp.where(g_mask, jnp.tanh(gates), jax.nn.sigmoid(gates))
        i_g = act[:, 0 * H:1 * H]          # PyTorch gate order i, f, g, o
        f_g = act[:, 1 * H:2 * H]
        g_g = act[:, 2 * H:3 * H]
        o_g = act[:, 3 * H:4 * H]
        c_new = f_g * c_sc[...] + i_g * g_g
        h_sc[...] = o_g * jnp.tanh(c_new)
        c_sc[...] = c_new
        return carry

    # Short fixed trip count: fully unroll so the scheduler sees across steps.
    # TODO(synk): for long sequences switch to a partial unroll (e.g. 4) and
    # stream xg per time-chunk instead of keeping it fully resident.
    lax.fori_loop(0, S, step, 0, unroll=True)

    # TODO(synk): reference module calls self.dropout(h_n) but never defines it;
    # treated as identity (eval-mode dropout).
    logits = (jnp.dot(h_sc[...], wl_ref[...], preferred_element_type=jnp.float32)
              + bl_ref[...])
    m = jnp.max(logits, axis=-1, keepdims=True)
    e = jnp.exp(logits - m)
    out_ref[...] = e / jnp.sum(e, axis=-1, keepdims=True)   # exact normalisation


def rnn_text_classifier(sent_word, emb_table, w_ih, w_hh, b_ih, b_hh, w_lin, b_lin):
    """sent_word: (S, B) int32 token ids.  Returns (B, class_num) softmax probs.
    Equivalent to the PyTorch module with num_layers=1, bidirectional=False,
    dropout as identity (eval mode)."""
    S, B = sent_word.shape
    V, E = emb_table.shape
    H = w_hh.shape[1]
    C = w_lin.shape[0]
    assert H % 8 == 0, "hidden_size must be a multiple of 8 (sublane alignment)"

    LP = ((4 * H + 127) // 128) * 128        # lane-padded width of packed gates
    B_pad = ((B + 7) // 8) * 8               # sublane-aligned batch
    # Fill MXU rows before splitting the grid (review: feed the MXU more rows).
    TB = min(B_pad, 256)
    B_pad = ((B_pad + TB - 1) // TB) * TB
    grid = (B_pad // TB,)

    # Fused input-projection table (f32, computed once host-side):
    #   T[v] = emb[v] @ W_ih^T + (b_ih + b_hh), gate order i|f|g|o, densely packed
    #   into the first 4*H lanes; padded lanes are zero.
    t_core = (emb_table.astype(jnp.float32) @ w_ih.T.astype(jnp.float32)
              + (b_ih + b_hh).astype(jnp.float32)[None, :])            # (V, 4H)
    t_fused = jnp.zeros((V, LP), jnp.float32).at[:, :4 * H].set(t_core)

    whh_p = jnp.zeros((H, LP), jnp.float32).at[:, :4 * H].set(w_hh.T.astype(jnp.float32))
    wl = w_lin.T.astype(jnp.float32)                                    # (H, C)
    bl = b_lin.reshape(1, C).astype(jnp.float32)

    # Token ids batch-major (B_pad, S); padded batch rows use token 0 and their
    # outputs are discarded below.  Batch-major layout makes grid > 1 correct.
    ids = jnp.zeros((B_pad, S), jnp.int32).at[:B, :].set(sent_word.T.astype(jnp.int32))

    out = pl.pallas_call(
        lstm_classifier_kernel,
        out_shape=jax.ShapeDtypeStruct((B_pad, C), jnp.float32),
        grid_spec=pltpu.PrefetchScalarGridSpec(
            num_scalar_prefetch=1,            # ids -> SMEM, readable as scalars
            grid=grid,
            in_specs=[
                pl.BlockSpec((V, LP), lambda i, ids: (0, 0)),   # fused T table
                pl.BlockSpec((H, LP), lambda i, ids: (0, 0)),   # W_hh^T (dense gates)
                pl.BlockSpec((H, C), lambda i, ids: (0, 0)),    # W_linear^T
                pl.BlockSpec((1, C), lambda i, ids: (0, 0)),    # b_linear
            ],
            out_specs=pl.BlockSpec((TB, C), lambda i, ids: (i, 0)),
            scratch_shapes=[
                pltpu.VMEM((TB, H), jnp.float32),      # h state
                pltpu.VMEM((TB, H), jnp.float32),      # c state
                pltpu.VMEM((S, TB, LP), jnp.float32),  # gathered input projection
            ],
        ),
        compiler_params=pltpu.CompilerParams(
            dimension_semantics=("parallel",),          # batch blocks -> 2 TCs on v7x
            vmem_limit_bytes=32 * 1024 * 1024,
        ),
    )(ids, t_fused, whh_p, wl, bl)
    return out[:B]


def reference_forward(sent_word, emb_table, w_ih, w_hh, b_ih, b_hh, w_lin, b_lin):
    """Pure-JAX reference: embedding -> single-layer LSTM -> final h -> linear -> softmax."""
    S, B = sent_word.shape
    H = w_hh.shape[1]
    x = emb_table[sent_word]                                  # (S, B, E)
    h = jnp.zeros((B, H), jnp.float32)
    c = jnp.zeros((B, H), jnp.float32)
    for t in range(S):
        gates = x[t] @ w_ih.T + b_ih + h @ w_hh.T + b_hh      # (B, 4H)
        i = jax.nn.sigmoid(gates[:, 0:H])
        f = jax.nn.sigmoid(gates[:, H:2 * H])
        g = jnp.tanh(gates[:, 2 * H:3 * H])
        o = jax.nn.sigmoid(gates[:, 3 * H:4 * H])
        c = f * c + i * g
        h = o * jnp.tanh(c)
    logits = h @ w_lin.T + b_lin
    return jax.nn.softmax(logits, axis=-1)


if __name__ == "__main__":
    # Small config consistent with the module's forward.
    word_count = 100
    embedding_dim = 32
    hidden_size = 32
    class_num = 8
    seq_len = 8
    batch = 4

    key = jax.random.PRNGKey(0)
    ks = jax.random.split(key, 8)
    k_scale = 1.0 / jnp.sqrt(hidden_size)

    emb_table = jax.random.normal(ks[0], (word_count, embedding_dim), jnp.float32)
    w_ih = jax.random.uniform(ks[1], (4 * hidden_size, embedding_dim), jnp.float32,
                              -k_scale, k_scale)
    w_hh = jax.random.uniform(ks[2], (4 * hidden_size, hidden_size), jnp.float32,
                              -k_scale, k_scale)
    b_ih = jax.random.uniform(ks[3], (4 * hidden_size,), jnp.float32, -k_scale, k_scale)
    b_hh = jax.random.uniform(ks[4], (4 * hidden_size,), jnp.float32, -k_scale, k_scale)
    w_lin = jax.random.uniform(ks[5], (class_num, hidden_size), jnp.float32,
                               -k_scale, k_scale)
    b_lin = jax.random.uniform(ks[6], (class_num,), jnp.float32, -k_scale, k_scale)

    sent_word = jax.random.randint(ks[7], (seq_len, batch), 0, word_count, jnp.int32)

    probs = rnn_text_classifier(sent_word, emb_table, w_ih, w_hh, b_ih, b_hh,
                                w_lin, b_lin)
    probs = jax.block_until_ready(probs)

    ref = reference_forward(sent_word, emb_table, w_ih, w_hh, b_ih, b_hh,
                            w_lin, b_lin)
    ref = jax.block_until_ready(ref)

    assert probs.shape == (batch, class_num)
    assert bool(jnp.all(jnp.isfinite(probs)))
    # Exact softmax normalisation -> rows sum to 1.
    assert bool(jnp.allclose(jnp.sum(probs, axis=-1), 1.0, atol=1e-3))
    # All-f32 kernel should match the pure-JAX reference closely.
    assert bool(jnp.allclose(probs, ref, atol=2e-3)), float(jnp.max(jnp.abs(probs - ref)))
    print("KERNEL_OK")
</pallas_src>

<mosaic_0001>
module attributes {stable_mosaic.version = 11 : i64} {
  func.func @lstm_classifier_kernel(%arg0: i32, %arg1: memref<8x8xi32, #tpu.memory_space<smem>>, %arg2: memref<100x128xf32, #tpu.memory_space<vmem>>, %arg3: memref<32x128xf32, #tpu.memory_space<vmem>>, %arg4: memref<32x8xf32, #tpu.memory_space<vmem>>, %arg5: memref<1x8xf32, #tpu.memory_space<vmem>>, %arg6: memref<8x8xf32, #tpu.memory_space<vmem>>, %arg7: memref<8x32xf32, #tpu.memory_space<vmem>>, %arg8: memref<8x32xf32, #tpu.memory_space<vmem>>, %arg9: memref<8x8x128xf32, #tpu.memory_space<vmem>>) attributes {dimension_semantics = [#tpu.dimension_semantics<parallel>], iteration_bounds = array<i64: 1>, scalar_prefetch = 1 : i64, scratch_operands = 3 : i64, tpu.core_type = #tpu.core_type<tc>, window_params = [{pipeline_mode = #tpu.pipeline_mode<synchronous>, transform_indices = @transform_0, window_bounds = array<i64: 100, 128>}, {pipeline_mode = #tpu.pipeline_mode<synchronous>, transform_indices = @transform_1, window_bounds = array<i64: 32, 128>}, {pipeline_mode = #tpu.pipeline_mode<synchronous>, transform_indices = @transform_2, window_bounds = array<i64: 32, 8>}, {pipeline_mode = #tpu.pipeline_mode<synchronous>, transform_indices = @transform_3, window_bounds = array<i64: 1, 8>}, {transform_indices = @transform_4, window_bounds = array<i64: 8, 8>}]} {
    %c8_i32 = arith.constant 8 : i32
    %0 = arith.muli %arg0, %c8_i32 : i32
    %c0_i32 = arith.constant 0 : i32
    %1 = arith.addi %0, %c0_i32 : i32
    %2 = arith.index_cast %1 : i32 to index
    %c0 = arith.constant 0 : index
    %3 = memref.load %arg1[%2, %c0] : memref<8x8xi32, #tpu.memory_space<smem>>
    %4 = arith.index_cast %3 : i32 to index
    %c0_0 = arith.constant 0 : index
    %5 = vector.load %arg2[%4, %c0_0] : memref<100x128xf32, #tpu.memory_space<vmem>>, vector<1x128xf32>
    %c0_1 = arith.constant 0 : index
    %c0_2 = arith.constant 0 : index
    %c0_3 = arith.constant 0 : index
    %6 = vector.load %arg9[%c0_1, %c0_2, %c0_3] : memref<8x8x128xf32, #tpu.memory_space<vmem>>, vector<1x1x128xf32>
    %7 = vector.shape_cast %6 : vector<1x1x128xf32> to vector<1x128xf32>
    %8 = vector.shape_cast %5 : vector<1x128xf32> to vector<1x1x128xf32>
    tpu.vector_store %arg9[%c0_1, %c0_2, %c0_3], %8 {strides = array<i32>} : memref<8x8x128xf32, #tpu.memory_space<vmem>>, vector<1x1x128xf32>,
    %c1_i32 = arith.constant 1 : i32
    %9 = arith.addi %0, %c1_i32 : i32
    %10 = arith.index_cast %9 : i32 to index
    %c0_4 = arith.constant 0 : index
    %11 = memref.load %arg1[%10, %c0_4] : memref<8x8xi32, #tpu.memory_space<smem>>
    %12 = arith.index_cast %11 : i32 to index
    %c0_5 = arith.constant 0 : index
    %13 = vector.load %arg2[%12, %c0_5] : memref<100x128xf32, #tpu.memory_space<vmem>>, vector<1x128xf32>
    %c0_6 = arith.constant 0 : index
    %c1 = arith.constant 1 : index
    %c0_7 = arith.constant 0 : index
    %14 = vector.load %arg9[%c0_6, %c1, %c0_7] : memref<8x8x128xf32, #tpu.memory_space<vmem>>, vector<1x1x128xf32>
    %15 = vector.shape_cast %14 : vector<1x1x128xf32> to vector<1x128xf32>
    %16 = vector.shape_cast %13 : vector<1x128xf32> to vector<1x1x128xf32>
    tpu.vector_store %arg9[%c0_6, %c1, %c0_7], %16 {strides = array<i32>} : memref<8x8x128xf32, #tpu.memory_space<vmem>>, vector<1x1x128xf32>,
    %c2_i32 = arith.constant 2 : i32
    %17 = arith.addi %0, %c2_i32 : i32
    %18 = arith.index_cast %17 : i32 to index
    %c0_8 = arith.constant 0 : index
    %19 = memref.load %arg1[%18, %c0_8] : memref<8x8xi32, #tpu.memory_space<smem>>
    %20 = arith.index_cast %19 : i32 to index
    %c0_9 = arith.constant 0 : index
    %21 = vector.load %arg2[%20, %c0_9] : memref<100x128xf32, #tpu.memory_space<vmem>>, vector<1x128xf32>
    %c0_10 = arith.constant 0 : index
    %c2 = arith.constant 2 : index
    %c0_11 = arith.constant 0 : index
    %22 = vector.load %arg9[%c0_10, %c2, %c0_11] : memref<8x8x128xf32, #tpu.memory_space<vmem>>, vector<1x1x128xf32>
    %23 = vector.shape_cast %22 : vector<1x1x128xf32> to vector<1x128xf32>
    %24 = vector.shape_cast %21 : vector<1x128xf32> to vector<1x1x128xf32>
    tpu.vector_store %arg9[%c0_10, %c2, %c0_11], %24 {strides = array<i32>} : memref<8x8x128xf32, #tpu.memory_space<vmem>>, vector<1x1x128xf32>,
    %c3_i32 = arith.constant 3 : i32
    %25 = arith.addi %0, %c3_i32 : i32
    %26 = arith.index_cast %25 : i32 to index
    %c0_12 = arith.constant 0 : index
    %27 = memref.load %arg1[%26, %c0_12] : memref<8x8xi32, #tpu.memory_space<smem>>
    %28 = arith.index_cast %27 : i32 to index
    %c0_13 = arith.constant 0 : index
    %29 = vector.load %arg2[%28, %c0_13] : memref<100x128xf32, #tpu.memory_space<vmem>>, vector<1x128xf32>
    %c0_14 = arith.constant 0 : index
    %c3 = arith.constant 3 : index
    %c0_15 = arith.constant 0 : index
    %30 = vector.load %arg9[%c0_14, %c3, %c0_15] : memref<8x8x128xf32, #tpu.memory_space<vmem>>, vector<1x1x128xf32>
    %31 = vector.shape_cast %30 : vector<1x1x128xf32> to vector<1x128xf32>
    %32 = vector.shape_cast %29 : vector<1x128xf32> to vector<1x1x128xf32>
    tpu.vector_store %arg9[%c0_14, %c3, %c0_15], %32 {strides = array<i32>} : memref<8x8x128xf32, #tpu.memory_space<vmem>>, vector<1x1x128xf32>,
    %c4_i32 = arith.constant 4 : i32
    %33 = arith.addi %0, %c4_i32 : i32
    %34 = arith.index_cast %33 : i32 to index
    %c0_16 = arith.constant 0 : index
    %35 = memref.load %arg1[%34, %c0_16] : memref<8x8xi32, #tpu.memory_space<smem>>
    %36 = arith.index_cast %35 : i32 to index
    %c0_17 = arith.constant 0 : index
    %37 = vector.load %arg2[%36, %c0_17] : memref<100x128xf32, #tpu.memory_space<vmem>>, vector<1x128xf32>
    %c0_18 = arith.constant 0 : index
    %c4 = arith.constant 4 : index
    %c0_19 = arith.constant 0 : index
    %38 = vector.load %arg9[%c0_18, %c4, %c0_19] : memref<8x8x128xf32, #tpu.memory_space<vmem>>, vector<1x1x128xf32>
    %39 = vector.shape_cast %38 : vector<1x1x128xf32> to vector<1x128xf32>
    %40 = vector.shape_cast %37 : vector<1x128xf32> to vector<1x1x128xf32>
    tpu.vector_store %arg9[%c0_18, %c4, %c0_19], %40 {strides = array<i32>} : memref<8x8x128xf32, #tpu.memory_space<vmem>>, vector<1x1x128xf32>,
    %c5_i32 = arith.constant 5 : i32
    %41 = arith.addi %0, %c5_i32 : i32
    %42 = arith.index_cast %41 : i32 to index
    %c0_20 = arith.constant 0 : index
    %43 = memref.load %arg1[%42, %c0_20] : memref<8x8xi32, #tpu.memory_space<smem>>
    %44 = arith.index_cast %43 : i32 to index
    %c0_21 = arith.constant 0 : index
    %45 = vector.load %arg2[%44, %c0_21] : memref<100x128xf32, #tpu.memory_space<vmem>>, vector<1x128xf32>
    %c0_22 = arith.constant 0 : index
    %c5 = arith.constant 5 : index
    %c0_23 = arith.constant 0 : index
    %46 = vector.load %arg9[%c0_22, %c5, %c0_23] : memref<8x8x128xf32, #tpu.memory_space<vmem>>, vector<1x1x128xf32>
    %47 = vector.shape_cast %46 : vector<1x1x128xf32> to vector<1x128xf32>
    %48 = vector.shape_cast %45 : vector<1x128xf32> to vector<1x1x128xf32>
    tpu.vector_store %arg9[%c0_22, %c5, %c0_23], %48 {strides = array<i32>} : memref<8x8x128xf32, #tpu.memory_space<vmem>>, vector<1x1x128xf32>,
    %c6_i32 = arith.constant 6 : i32
    %49 = arith.addi %0, %c6_i32 : i32
    %50 = arith.index_cast %49 : i32 to index
    %c0_24 = arith.constant 0 : index
    %51 = memref.load %arg1[%50, %c0_24] : memref<8x8xi32, #tpu.memory_space<smem>>
    %52 = arith.index_cast %51 : i32 to index
    %c0_25 = arith.constant 0 : index
    %53 = vector.load %arg2[%52, %c0_25] : memref<100x128xf32, #tpu.memory_space<vmem>>, vector<1x128xf32>
    %c0_26 = arith.constant 0 : index
    %c6 = arith.constant 6 : index
    %c0_27 = arith.constant 0 : index
    %54 = vector.load %arg9[%c0_26, %c6, %c0_27] : memref<8x8x128xf32, #tpu.memory_space<vmem>>, vector<1x1x128xf32>
    %55 = vector.shape_cast %54 : vector<1x1x128xf32> to vector<1x128xf32>
    %56 = vector.shape_cast %53 : vector<1x128xf32> to vector<1x1x128xf32>
    tpu.vector_store %arg9[%c0_26, %c6, %c0_27], %56 {strides = array<i32>} : memref<8x8x128xf32, #tpu.memory_space<vmem>>, vector<1x1x128xf32>,
    %c7_i32 = arith.constant 7 : i32
    %57 = arith.addi %0, %c7_i32 : i32
    %58 = arith.index_cast %57 : i32 to index
    %c0_28 = arith.constant 0 : index
    %59 = memref.load %arg1[%58, %c0_28] : memref<8x8xi32, #tpu.memory_space<smem>>
    %60 = arith.index_cast %59 : i32 to index
    %c0_29 = arith.constant 0 : index
    %61 = vector.load %arg2[%60, %c0_29] : memref<100x128xf32, #tpu.memory_space<vmem>>, vector<1x128xf32>
    %c0_30 = arith.constant 0 : index
    %c7 = arith.constant 7 : index
    %c0_31 = arith.constant 0 : index
    %62 = vector.load %arg9[%c0_30, %c7, %c0_31] : memref<8x8x128xf32, #tpu.memory_space<vmem>>, vector<1x1x128xf32>
    %63 = vector.shape_cast %62 : vector<1x1x128xf32> to vector<1x128xf32>
    %64 = vector.shape_cast %61 : vector<1x128xf32> to vector<1x1x128xf32>
    tpu.vector_store %arg9[%c0_30, %c7, %c0_31], %64 {strides = array<i32>} : memref<8x8x128xf32, #tpu.memory_space<vmem>>, vector<1x1x128xf32>,
    %c0_i32_32 = arith.constant 0 : i32
    %65 = arith.addi %0, %c0_i32_32 : i32
    %66 = arith.index_cast %65 : i32 to index
    %c1_33 = arith.constant 1 : index
    %67 = memref.load %arg1[%66, %c1_33] : memref<8x8xi32, #tpu.memory_space<smem>>
    %68 = arith.index_cast %67 : i32 to index
    %c0_34 = arith.constant 0 : index
    %69 = vector.load %arg2[%68, %c0_34] : memref<100x128xf32, #tpu.memory_space<vmem>>, vector<1x128xf32>
    %c1_35 = arith.constant 1 : index
    %c0_36 = arith.constant 0 : index
    %c0_37 = arith.constant 0 : index
    %70 = vector.load %arg9[%c1_35, %c0_36, %c0_37] : memref<8x8x128xf32, #tpu.memory_space<vmem>>, vector<1x1x128xf32>
    %71 = vector.shape_cast %70 : vector<1x1x128xf32> to vector<1x128xf32>
    %72 = vector.shape_cast %69 : vector<1x128xf32> to vector<1x1x128xf32>
    tpu.vector_store %arg9[%c1_35, %c0_36, %c0_37], %72 {strides = array<i32>} : memref<8x8x128xf32, #tpu.memory_space<vmem>>, vector<1x1x128xf32>,
    %c1_i32_38 = arith.constant 1 : i32
    %73 = arith.addi %0, %c1_i32_38 : i32
    %74 = arith.index_cast %73 : i32 to index
    %c1_39 = arith.constant 1 : index
    %75 = memref.load %arg1[%74, %c1_39] : memref<8x8xi32, #tpu.memory_space<smem>>
    %76 = arith.index_cast %75 : i32 to index
    %c0_40 = arith.constant 0 : index
    %77 = vector.load %arg2[%76, %c0_40] : memref<100x128xf32, #tpu.memory_space<vmem>>, vector<1x128xf32>
    %c1_41 = arith.constant 1 : index
    %c1_42 = arith.constant 1 : index
    %c0_43 = arith.constant 0 : index
    %78 = vector.load %arg9[%c1_41, %c1_42, %c0_43] : memref<8x8x128xf32, #tpu.memory_space<vmem>>, vector<1x1x128xf32>
    %79 = vector.shape_cast %78 : vector<1x1x128xf32> to vector<1x128xf32>
    %80 = vector.shape_cast %77 : vector<1x128xf32> to vector<1x1x128xf32>
    tpu.vector_store %arg9[%c1_41, %c1_42, %c0_43], %80 {strides = array<i32>} : memref<8x8x128xf32, #tpu.memory_space<vmem>>, vector<1x1x128xf32>,
    %c2_i32_44 = arith.constant 2 : i32
    %81 = arith.addi %0, %c2_i32_44 : i32
    %82 = arith.index_cast %81 : i32 to index
    %c1_45 = arith.constant 1 : index
    %83 = memref.load %arg1[%82, %c1_45] : memref<8x8xi32, #tpu.memory_space<smem>>
    %84 = arith.index_cast %83 : i32 to index
    %c0_46 = arith.constant 0 : index
    %85 = vector.load %arg2[%84, %c0_46] : memref<100x128xf32, #tpu.memory_space<vmem>>, vector<1x128xf32>
    %c1_47 = arith.constant 1 : index
    %c2_48 = arith.constant 2 : index
    %c0_49 = arith.constant 0 : index
    %86 = vector.load %arg9[%c1_47, %c2_48, %c0_49] : memref<8x8x128xf32, #tpu.memory_space<vmem>>, vector<1x1x128xf32>
    %87 = vector.shape_cast %86 : vector<1x1x128xf32> to vector<1x128xf32>
    %88 = vector.shape_cast %85 : vector<1x128xf32> to vector<1x1x128xf32>
    tpu.vector_store %arg9[%c1_47, %c2_48, %c0_49], %88 {strides = array<i32>} : memref<8x8x128xf32, #tpu.memory_space<vmem>>, vector<1x1x128xf32>,
    %c3_i32_50 = arith.constant 3 : i32
    %89 = arith.addi %0, %c3_i32_50 : i32
    %90 = arith.index_cast %89 : i32 to index
    %c1_51 = arith.constant 1 : index
    %91 = memref.load %arg1[%90, %c1_51] : memref<8x8xi32, #tpu.memory_space<smem>>
    %92 = arith.index_cast %91 : i32 to index
    %c0_52 = arith.constant 0 : index
    %93 = vector.load %arg2[%92, %c0_52] : memref<100x128xf32, #tpu.memory_space<vmem>>, vector<1x128xf32>
    %c1_53 = arith.constant 1 : index
    %c3_54 = arith.constant 3 : index
    %c0_55 = arith.constant 0 : index
    %94 = vector.load %arg9[%c1_53, %c3_54, %c0_55] : memref<8x8x128xf32, #tpu.memory_space<vmem>>, vector<1x1x128xf32>
    %95 = vector.shape_cast %94 : vector<1x1x128xf32> to vector<1x128xf32>
    %96 = vector.shape_cast %93 : vector<1x128xf32> to vector<1x1x128xf32>
    tpu.vector_store %arg9[%c1_53, %c3_54, %c0_55], %96 {strides = array<i32>} : memref<8x8x128xf32, #tpu.memory_space<vmem>>, vector<1x1x128xf32>,
    %c4_i32_56 = arith.constant 4 : i32
    %97 = arith.addi %0, %c4_i32_56 : i32
    %98 = arith.index_cast %97 : i32 to index
    %c1_57 = arith.constant 1 : index
    %99 = memref.load %arg1[%98, %c1_57] : memref<8x8xi32, #tpu.memory_space<smem>>
    %100 = arith.index_cast %99 : i32 to index
    %c0_58 = arith.constant 0 : index
    %101 = vector.load %arg2[%100, %c0_58] : memref<100x128xf32, #tpu.memory_space<vmem>>, vector<1x128xf32>
    %c1_59 = arith.constant 1 : index
    %c4_60 = arith.constant 4 : index
    %c0_61 = arith.constant 0 : index
    %102 = vector.load %arg9[%c1_59, %c4_60, %c0_61] : memref<8x8x128xf32, #tpu.memory_space<vmem>>, vector<1x1x128xf32>
    %103 = vector.shape_cast %102 : vector<1x1x128xf32> to vector<1x128xf32>
    %104 = vector.shape_cast %101 : vector<1x128xf32> to vector<1x1x128xf32>
    tpu.vector_store %arg9[%c1_59, %c4_60, %c0_61], %104 {strides = array<i32>} : memref<8x8x128xf32, #tpu.memory_space<vmem>>, vector<1x1x128xf32>,
    %c5_i32_62 = arith.constant 5 : i32
    %105 = arith.addi %0, %c5_i32_62 : i32
    %106 = arith.index_cast %105 : i32 to index
    %c1_63 = arith.constant 1 : index
    %107 = memref.load %arg1[%106, %c1_63] : memref<8x8xi32, #tpu.memory_space<smem>>
    %108 = arith.index_cast %107 : i32 to index
    %c0_64 = arith.constant 0 : index
    %109 = vector.load %arg2[%108, %c0_64] : memref<100x128xf32, #tpu.memory_space<vmem>>, vector<1x128xf32>
    %c1_65 = arith.constant 1 : index
    %c5_66 = arith.constant 5 : index
    %c0_67 = arith.constant 0 : index
    %110 = vector.load %arg9[%c1_65, %c5_66, %c0_67] : memref<8x8x128xf32, #tpu.memory_space<vmem>>, vector<1x1x128xf32>
    %111 = vector.shape_cast %110 : vector<1x1x128xf32> to vector<1x128xf32>
    %112 = vector.shape_cast %109 : vector<1x128xf32> to vector<1x1x128xf32>
    tpu.vector_store %arg9[%c1_65, %c5_66, %c0_67], %112 {strides = array<i32>} : memref<8x8x128xf32, #tpu.memory_space<vmem>>, vector<1x1x128xf32>,
    %c6_i32_68 = arith.constant 6 : i32
    %113 = arith.addi %0, %c6_i32_68 : i32
    %114 = arith.index_cast %113 : i32 to index
    %c1_69 = arith.constant 1 : index
    %115 = memref.load %arg1[%114, %c1_69] : memref<8x8xi32, #tpu.memory_space<smem>>
    %116 = arith.index_cast %115 : i32 to index
    %c0_70 = arith.constant 0 : index
    %117 = vector.load %arg2[%116, %c0_70] : memref<100x128xf32, #tpu.memory_space<vmem>>, vector<1x128xf32>
    %c1_71 = arith.constant 1 : index
    %c6_72 = arith.constant 6 : index
    %c0_73 = arith.constant 0 : index
    %118 = vector.load %arg9[%c1_71, %c6_72, %c0_73] : memref<8x8x128xf32, #tpu.memory_space<vmem>>, vector<1x1x128xf32>
    %119 = vector.shape_cast %118 : vector<1x1x128xf32> to vector<1x128xf32>
    %120 = vector.shape_cast %117 : vector<1x128xf32> to vector<1x1x128xf32>
    tpu.vector_store %arg9[%c1_71, %c6_72, %c0_73], %120 {strides = array<i32>} : memref<8x8x128xf32, #tpu.memory_space<vmem>>, vector<1x1x128xf32>,
    %c7_i32_74 = arith.constant 7 : i32
    %121 = arith.addi %0, %c7_i32_74 : i32
    %122 = arith.index_cast %121 : i32 to index
    %c1_75 = arith.constant 1 : index
    %123 = memref.load %arg1[%122, %c1_75] : memref<8x8xi32, #tpu.memory_space<smem>>
    %124 = arith.index_cast %123 : i32 to index
    %c0_76 = arith.constant 0 : index
    %125 = vector.load %arg2[%124, %c0_76] : memref<100x128xf32, #tpu.memory_space<vmem>>, vector<1x128xf32>
    %c1_77 = arith.constant 1 : index
    %c7_78 = arith.constant 7 : index
    %c0_79 = arith.constant 0 : index
    %126 = vector.load %arg9[%c1_77, %c7_78, %c0_79] : memref<8x8x128xf32, #tpu.memory_space<vmem>>, vector<1x1x128xf32>
    %127 = vector.shape_cast %126 : vector<1x1x128xf32> to vector<1x128xf32>
    %128 = vector.shape_cast %125 : vector<1x128xf32> to vector<1x1x128xf32>
    tpu.vector_store %arg9[%c1_77, %c7_78, %c0_79], %128 {strides = array<i32>} : memref<8x8x128xf32, #tpu.memory_space<vmem>>, vector<1x1x128xf32>,
    %c0_i32_80 = arith.constant 0 : i32
    %129 = arith.addi %0, %c0_i32_80 : i32
    %130 = arith.index_cast %129 : i32 to index
    %c2_81 = arith.constant 2 : index
    %131 = memref.load %arg1[%130, %c2_81] : memref<8x8xi32, #tpu.memory_space<smem>>
    %132 = arith.index_cast %131 : i32 to index
    %c0_82 = arith.constant 0 : index
    %133 = vector.load %arg2[%132, %c0_82] : memref<100x128xf32, #tpu.memory_space<vmem>>, vector<1x128xf32>
    %c2_83 = arith.constant 2 : index
    %c0_84 = arith.constant 0 : index
    %c0_85 = arith.constant 0 : index
    %134 = vector.load %arg9[%c2_83, %c0_84, %c0_85] : memref<8x8x128xf32, #tpu.memory_space<vmem>>, vector<1x1x128xf32>
    %135 = vector.shape_cast %134 : vector<1x1x128xf32> to vector<1x128xf32>
    %136 = vector.shape_cast %133 : vector<1x128xf32> to vector<1x1x128xf32>
    tpu.vector_store %arg9[%c2_83, %c0_84, %c0_85], %136 {strides = array<i32>} : memref<8x8x128xf32, #tpu.memory_space<vmem>>, vector<1x1x128xf32>,
    %c1_i32_86 = arith.constant 1 : i32
    %137 = arith.addi %0, %c1_i32_86 : i32
    %138 = arith.index_cast %137 : i32 to index
    %c2_87 = arith.constant 2 : index
    %139 = memref.load %arg1[%138, %c2_87] : memref<8x8xi32, #tpu.memory_space<smem>>
    %140 = arith.index_cast %139 : i32 to index
    %c0_88 = arith.constant 0 : index
    %141 = vector.load %arg2[%140, %c0_88] : memref<100x128xf32, #tpu.memory_space<vmem>>, vector<1x128xf32>
    %c2_89 = arith.constant 2 : index
    %c1_90 = arith.constant 1 : index
    %c0_91 = arith.constant 0 : index
    %142 = vector.load %arg9[%c2_89, %c1_90, %c0_91] : memref<8x8x128xf32, #tpu.memory_space<vmem>>, vector<1x1x128xf32>
    %143 = vector.shape_cast %142 : vector<1x1x128xf32> to vector<1x128xf32>
    %144 = vector.shape_cast %141 : vector<1x128xf32> to vector<1x1x128xf32>
    tpu.vector_store %arg9[%c2_89, %c1_90, %c0_91], %144 {strides = array<i32>} : memref<8x8x128xf32, #tpu.memory_space<vmem>>, vector<1x1x128xf32>,
    %c2_i32_92 = arith.constant 2 : i32
    %145 = arith.addi %0, %c2_i32_92 : i32
    %146 = arith.index_cast %145 : i32 to index
    %c2_93 = arith.constant 2 : index
    %147 = memref.load %arg1[%146, %c2_93] : memref<8x8xi32, #tpu.memory_space<smem>>
    %148 = arith.index_cast %147 : i32 to index
    %c0_94 = arith.constant 0 : index
    %149 = vector.load %arg2[%148, %c0_94] : memref<100x128xf32, #tpu.memory_space<vmem>>, vector<1x128xf32>
    %c2_95 = arith.constant 2 : index
    %c2_96 = arith.constant 2 : index
    %c0_97 = arith.constant 0 : index
    %150 = vector.load %arg9[%c2_95, %c2_96, %c0_97] : memref<8x8x128xf32, #tpu.memory_space<vmem>>, vector<1x1x128xf32>
    %151 = vector.shape_cast %150 : vector<1x1x128xf32> to vector<1x128xf32>
    %152 = vector.shape_cast %149 : vector<1x128xf32> to vector<1x1x128xf32>
    tpu.vector_store %arg9[%c2_95, %c2_96, %c0_97], %152 {strides = array<i32>} : memref<8x8x128xf32, #tpu.memory_space<vmem>>, vector<1x1x128xf32>,
    %c3_i32_98 = arith.constant 3 : i32
    %153 = arith.addi %0, %c3_i32_98 : i32
    %154 = arith.index_cast %153 : i32 to index
    %c2_99 = arith.constant 2 : index
    %155 = memref.load %arg1[%154, %c2_99] : memref<8x8xi32, #tpu.memory_space<smem>>
    %156 = arith.index_cast %155 : i32 to index
    %c0_100 = arith.constant 0 : index
    %157 = vector.load %arg2[%156, %c0_100] : memref<100x128xf32, #tpu.memory_space<vmem>>, vector<1x128xf32>
    %c2_101 = arith.constant 2 : index
    %c3_102 = arith.constant 3 : index
    %c0_103 = arith.constant 0 : index
    %158 = vector.load %arg9[%c2_101, %c3_102, %c0_103] : memref<8x8x128xf32, #tpu.memory_space<vmem>>, vector<1x1x128xf32>
    %159 = vector.shape_cast %158 : vector<1x1x128xf32> to vector<1x128xf32>
    %160 = vector.shape_cast %157 : vector<1x128xf32> to vector<1x1x128xf32>
    tpu.vector_store %arg9[%c2_101, %c3_102, %c0_103], %160 {strides = array<i32>} : memref<8x8x128xf32, #tpu.memory_space<vmem>>, vector<1x1x128xf32>,
    %c4_i32_104 = arith.constant 4 : i32
    %161 = arith.addi %0, %c4_i32_104 : i32
    %162 = arith.index_cast %161 : i32 to index
    %c2_105 = arith.constant 2 : index
    %163 = memref.load %arg1[%162, %c2_105] : memref<8x8xi32, #tpu.memory_space<smem>>
    %164 = arith.index_cast %163 : i32 to index
    %c0_106 = arith.constant 0 : index
    %165 = vector.load %arg2[%164, %c0_106] : memref<100x128xf32, #tpu.memory_space<vmem>>, vector<1x128xf32>
    %c2_107 = arith.constant 2 : index
    %c4_108 = arith.constant 4 : index
    %c0_109 = arith.constant 0 : index
    %166 = vector.load %arg9[%c2_107, %c4_108, %c0_109] : memref<8x8x128xf32, #tpu.memory_space<vmem>>, vector<1x1x128xf32>
    %167 = vector.shape_cast %166 : vector<1x1x128xf32> to vector<1x128xf32>
    %168 = vector.shape_cast %165 : vector<1x128xf32> to vector<1x1x128xf32>
    tpu.vector_store %arg9[%c2_107, %c4_108, %c0_109], %168 {strides = array<i32>} : memref<8x8x128xf32, #tpu.memory_space<vmem>>, vector<1x1x128xf32>,
    %c5_i32_110 = arith.constant 5 : i32
    %169 = arith.addi %0, %c5_i32_110 : i32
    %170 = arith.index_cast %169 : i32 to index
    %c2_111 = arith.constant 2 : index
    %171 = memref.load %arg1[%170, %c2_111] : memref<8x8xi32, #tpu.memory_space<smem>>
    %172 = arith.index_cast %171 : i32 to index
    %c0_112 = arith.constant 0 : index
    %173 = vector.load %arg2[%172, %c0_112] : memref<100x128xf32, #tpu.memory_space<vmem>>, vector<1x128xf32>
    %c2_113 = arith.constant 2 : index
    %c5_114 = arith.constant 5 : index
    %c0_115 = arith.constant 0 : index
    %174 = vector.load %arg9[%c2_113, %c5_114, %c0_115] : memref<8x8x128xf32, #tpu.memory_space<vmem>>, vector<1x1x128xf32>
    %175 = vector.shape_cast %174 : vector<1x1x128xf32> to vector<1x128xf32>
    %176 = vector.shape_cast %173 : vector<1x128xf32> to vector<1x1x128xf32>
    tpu.vector_store %arg9[%c2_113, %c5_114, %c0_115], %176 {strides = array<i32>} : memref<8x8x128xf32, #tpu.memory_space<vmem>>, vector<1x1x128xf32>,
    %c6_i32_116 = arith.constant 6 : i32
    %177 = arith.addi %0, %c6_i32_116 : i32
    %178 = arith.index_cast %177 : i32 to index
    %c2_117 = arith.constant 2 : index
    %179 = memref.load %arg1[%178, %c2_117] : memref<8x8xi32, #tpu.memory_space<smem>>
    %180 = arith.index_cast %179 : i32 to index
    %c0_118 = arith.constant 0 : index
    %181 = vector.load %arg2[%180, %c0_118] : memref<100x128xf32, #tpu.memory_space<vmem>>, vector<1x128xf32>
    %c2_119 = arith.constant 2 : index
    %c6_120 = arith.constant 6 : index
    %c0_121 = arith.constant 0 : index
    %182 = vector.load %arg9[%c2_119, %c6_120, %c0_121] : memref<8x8x128xf32, #tpu.memory_space<vmem>>, vector<1x1x128xf32>
    %183 = vector.shape_cast %182 : vector<1x1x128xf32> to vector<1x128xf32>
    %184 = vector.shape_cast %181 : vector<1x128xf32> to vector<1x1x128xf32>
    tpu.vector_store %arg9[%c2_119, %c6_120, %c0_121], %184 {strides = array<i32>} : memref<8x8x128xf32, #tpu.memory_space<vmem>>, vector<1x1x128xf32>,
    %c7_i32_122 = arith.constant 7 : i32
    %185 = arith.addi %0, %c7_i32_122 : i32
    %186 = arith.index_cast %185 : i32 to index
    %c2_123 = arith.constant 2 : index
    %187 = memref.load %arg1[%186, %c2_123] : memref<8x8xi32, #tpu.memory_space<smem>>
    %188 = arith.index_cast %187 : i32 to index
    %c0_124 = arith.constant 0 : index
    %189 = vector.load %arg2[%188, %c0_124] : memref<100x128xf32, #tpu.memory_space<vmem>>, vector<1x128xf32>
    %c2_125 = arith.constant 2 : index
    %c7_126 = arith.constant 7 : index
    %c0_127 = arith.constant 0 : index
    %190 = vector.load %arg9[%c2_125, %c7_126, %c0_127] : memref<8x8x128xf32, #tpu.memory_space<vmem>>, vector<1x1x128xf32>
    %191 = vector.shape_cast %190 : vector<1x1x128xf32> to vector<1x128xf32>
    %192 = vector.shape_cast %189 : vector<1x128xf32> to vector<1x1x128xf32>
    tpu.vector_store %arg9[%c2_125, %c7_126, %c0_127], %192 {strides = array<i32>} : memref<8x8x128xf32, #tpu.memory_space<vmem>>, vector<1x1x128xf32>,
    %c0_i32_128 = arith.constant 0 : i32
    %193 = arith.addi %0, %c0_i32_128 : i32
    %194 = arith.index_cast %193 : i32 to index
    %c3_129 = arith.constant 3 : index
    %195 = memref.load %arg1[%194, %c3_129] : memref<8x8xi32, #tpu.memory_space<smem>>
    %196 = arith.index_cast %195 : i32 to index
    %c0_130 = arith.constant 0 : index
    %197 = vector.load %arg2[%196, %c0_130] : memref<100x128xf32, #tpu.memory_space<vmem>>, vector<1x128xf32>
    %c3_131 = arith.constant 3 : index
    %c0_132 = arith.constant 0 : index
    %c0_133 = arith.constant 0 : index
    %198 = vector.load %arg9[%c3_131, %c0_132, %c0_133] : memref<8x8x128xf32, #tpu.memory_space<vmem>>, vector<1x1x128xf32>
    %199 = vector.shape_cast %198 : vector<1x1x128xf32> to vector<1x128xf32>
    %200 = vector.shape_cast %197 : vector<1x128xf32> to vector<1x1x128xf32>
    tpu.vector_store %arg9[%c3_131, %c0_132, %c0_133], %200 {strides = array<i32>} : memref<8x8x128xf32, #tpu.memory_space<vmem>>, vector<1x1x128xf32>,
    %c1_i32_134 = arith.constant 1 : i32
    %201 = arith.addi %0, %c1_i32_134 : i32
    %202 = arith.index_cast %201 : i32 to index
    %c3_135 = arith.constant 3 : index
    %203 = memref.load %arg1[%202, %c3_135] : memref<8x8xi32, #tpu.memory_space<smem>>
    %204 = arith.index_cast %203 : i32 to index
    %c0_136 = arith.constant 0 : index
    %205 = vector.load %arg2[%204, %c0_136] : memref<100x128xf32, #tpu.memory_space<vmem>>, vector<1x128xf32>
    %c3_137 = arith.constant 3 : index
    %c1_138 = arith.constant 1 : index
    %c0_139 = arith.constant 0 : index
    %206 = vector.load %arg9[%c3_137, %c1_138, %c0_139] : memref<8x8x128xf32, #tpu.memory_space<vmem>>, vector<1x1x128xf32>
    %207 = vector.shape_cast %206 : vector<1x1x128xf32> to vector<1x128xf32>
    %208 = vector.shape_cast %205 : vector<1x128xf32> to vector<1x1x128xf32>
    tpu.vector_store %arg9[%c3_137, %c1_138, %c0_139], %208 {strides = array<i32>} : memref<8x8x128xf32, #tpu.memory_space<vmem>>, vector<1x1x128xf32>,
    %c2_i32_140 = arith.constant 2 : i32
    %209 = arith.addi %0, %c2_i32_140 : i32
    %210 = arith.index_cast %209 : i32 to index
    %c3_141 = arith.constant 3 : index
    %211 = memref.load %arg1[%210, %c3_141] : memref<8x8xi32, #tpu.memory_space<smem>>
    %212 = arith.index_cast %211 : i32 to index
    %c0_142 = arith.constant 0 : index
    %213 = vector.load %arg2[%212, %c0_142] : memref<100x128xf32, #tpu.memory_space<vmem>>, vector<1x128xf32>
    %c3_143 = arith.constant 3 : index
    %c2_144 = arith.constant 2 : index
    %c0_145 = arith.constant 0 : index
    %214 = vector.load %arg9[%c3_143, %c2_144, %c0_145] : memref<8x8x128xf32, #tpu.memory_space<vmem>>, vector<1x1x128xf32>
    %215 = vector.shape_cast %214 : vector<1x1x128xf32> to vector<1x128xf32>
    %216 = vector.shape_cast %213 : vector<1x128xf32> to vector<1x1x128xf32>
    tpu.vector_store %arg9[%c3_143, %c2_144, %c0_145], %216 {strides = array<i32>} : memref<8x8x128xf32, #tpu.memory_space<vmem>>, vector<1x1x128xf32>,
    %c3_i32_146 = arith.constant 3 : i32
    %217 = arith.addi %0, %c3_i32_146 : i32
    %218 = arith.index_cast %217 : i32 to index
    %c3_147 = arith.constant 3 : index
    %219 = memref.load %arg1[%218, %c3_147] : memref<8x8xi32, #tpu.memory_space<smem>>
    %220 = arith.index_cast %219 : i32 to index
    %c0_148 = arith.constant 0 : index
    %221 = vector.load %arg2[%220, %c0_148] : memref<100x128xf32, #tpu.memory_space<vmem>>, vector<1x128xf32>
    %c3_149 = arith.constant 3 : index
    %c3_150 = arith.constant 3 : index
    %c0_151 = arith.constant 0 : index
    %222 = vector.load %arg9[%c3_149, %c3_150, %c0_151] : memref<8x8x128xf32, #tpu.memory_space<vmem>>, vector<1x1x128xf32>
    %223 = vector.shape_cast %222 : vector<1x1x128xf32> to vector<1x128xf32>
    %224 = vector.shape_cast %221 : vector<1x128xf32> to vector<1x1x128xf32>
    tpu.vector_store %arg9[%c3_149, %c3_150, %c0_151], %224 {strides = array<i32>} : memref<8x8x128xf32, #tpu.memory_space<vmem>>, vector<1x1x128xf32>,
    %c4_i32_152 = arith.constant 4 : i32
    %225 = arith.addi %0, %c4_i32_152 : i32
    %226 = arith.index_cast %225 : i32 to index
    %c3_153 = arith.constant 3 : index
    %227 = memref.load %arg1[%226, %c3_153] : memref<8x8xi32, #tpu.memory_space<smem>>
    %228 = arith.index_cast %227 : i32 to index
    %c0_154 = arith.constant 0 : index
    %229 = vector.load %arg2[%228, %c0_154] : memref<100x128xf32, #tpu.memory_space<vmem>>, vector<1x128xf32>
    %c3_155 = arith.constant 3 : index
    %c4_156 = arith.constant 4 : index
    %c0_157 = arith.constant 0 : index
    %230 = vector.load %arg9[%c3_155, %c4_156, %c0_157] : memref<8x8x128xf32, #tpu.memory_space<vmem>>, vector<1x1x128xf32>
    %231 = vector.shape_cast %230 : vector<1x1x128xf32> to vector<1x128xf32>
    %232 = vector.shape_cast %229 : vector<1x128xf32> to vector<1x1x128xf32>
    tpu.vector_store %arg9[%c3_155, %c4_156, %c0_157], %232 {strides = array<i32>} : memref<8x8x128xf32, #tpu.memory_space<vmem>>, vector<1x1x128xf32>,
    %c5_i32_158 = arith.constant 5 : i32
    %233 = arith.addi %0, %c5_i32_158 : i32
    %234 = arith.index_cast %233 : i32 to index
    %c3_159 = arith.constant 3 : index
    %235 = memref.load %arg1[%234, %c3_159] : memref<8x8xi32, #tpu.memory_space<smem>>
    %236 = arith.index_cast %235 : i32 to index
    %c0_160 = arith.constant 0 : index
    %237 = vector.load %arg2[%236, %c0_160] : memref<100x128xf32, #tpu.memory_space<vmem>>, vector<1x128xf32>
    %c3_161 = arith.constant 3 : index
    %c5_162 = arith.constant 5 : index
    %c0_163 = arith.constant 0 : index
    %238 = vector.load %arg9[%c3_161, %c5_162, %c0_163] : memref<8x8x128xf32, #tpu.memory_space<vmem>>, vector<1x1x128xf32>
    %239 = vector.shape_cast %238 : vector<1x1x128xf32> to vector<1x128xf32>
    %240 = vector.shape_cast %237 : vector<1x128xf32> to vector<1x1x128xf32>
    tpu.vector_store %arg9[%c3_161, %c5_162, %c0_163], %240 {strides = array<i32>} : memref<8x8x128xf32, #tpu.memory_space<vmem>>, vector<1x1x128xf32>,
    %c6_i32_164 = arith.constant 6 : i32
    %241 = arith.addi %0, %c6_i32_164 : i32
    %242 = arith.index_cast %241 : i32 to index
    %c3_165 = arith.constant 3 : index
    %243 = memref.load %arg1[%242, %c3_165] : memref<8x8xi32, #tpu.memory_space<smem>>
    %244 = arith.index_cast %243 : i32 to index
    %c0_166 = arith.constant 0 : index
    %245 = vector.load %arg2[%244, %c0_166] : memref<100x128xf32, #tpu.memory_space<vmem>>, vector<1x128xf32>
    %c3_167 = arith.constant 3 : index
    %c6_168 = arith.constant 6 : index
    %c0_169 = arith.constant 0 : index
    %246 = vector.load %arg9[%c3_167, %c6_168, %c0_169] : memref<8x8x128xf32, #tpu.memory_space<vmem>>, vector<1x1x128xf32>
    %247 = vector.shape_cast %246 : vector<1x1x128xf32> to vector<1x128xf32>
    %248 = vector.shape_cast %245 : vector<1x128xf32> to vector<1x1x128xf32>
    tpu.vector_store %arg9[%c3_167, %c6_168, %c0_169], %248 {strides = array<i32>} : memref<8x8x128xf32, #tpu.memory_space<vmem>>, vector<1x1x128xf32>,
    %c7_i32_170 = arith.constant 7 : i32
    %249 = arith.addi %0, %c7_i32_170 : i32
    %250 = arith.index_cast %249 : i32 to index
    %c3_171 = arith.constant 3 : index
    %251 = memref.load %arg1[%250, %c3_171] : memref<8x8xi32, #tpu.memory_space<smem>>
    %252 = arith.index_cast %251 : i32 to index
    %c0_172 = arith.constant 0 : index
    %253 = vector.load %arg2[%252, %c0_172] : memref<100x128xf32, #tpu.memory_space<vmem>>, vector<1x128xf32>
    %c3_173 = arith.constant 3 : index
    %c7_174 = arith.constant 7 : index
    %c0_175 = arith.constant 0 : index
    %254 = vector.load %arg9[%c3_173, %c7_174, %c0_175] : memref<8x8x128xf32, #tpu.memory_space<vmem>>, vector<1x1x128xf32>
    %255 = vector.shape_cast %254 : vector<1x1x128xf32> to vector<1x128xf32>
    %256 = vector.shape_cast %253 : vector<1x128xf32> to vector<1x1x128xf32>
    tpu.vector_store %arg9[%c3_173, %c7_174, %c0_175], %256 {strides = array<i32>} : memref<8x8x128xf32, #tpu.memory_space<vmem>>, vector<1x1x128xf32>,
    %c0_i32_176 = arith.constant 0 : i32
    %257 = arith.addi %0, %c0_i32_176 : i32
    %258 = arith.index_cast %257 : i32 to index
    %c4_177 = arith.constant 4 : index
    %259 = memref.load %arg1[%258, %c4_177] : memref<8x8xi32, #tpu.memory_space<smem>>
    %260 = arith.index_cast %259 : i32 to index
    %c0_178 = arith.constant 0 : index
    %261 = vector.load %arg2[%260, %c0_178] : memref<100x128xf32, #tpu.memory_space<vmem>>, vector<1x128xf32>
    %c4_179 = arith.constant 4 : index
    %c0_180 = arith.constant 0 : index
    %c0_181 = arith.constant 0 : index
    %262 = vector.load %arg9[%c4_179, %c0_180, %c0_181] : memref<8x8x128xf32, #tpu.memory_space<vmem>>, vector<1x1x128xf32>
    %263 = vector.shape_cast %262 : vector<1x1x128xf32> to vector<1x128xf32>
    %264 = vector.shape_cast %261 : vector<1x128xf32> to vector<1x1x128xf32>
    tpu.vector_store %arg9[%c4_179, %c0_180, %c0_181], %264 {strides = array<i32>} : memref<8x8x128xf32, #tpu.memory_space<vmem>>, vector<1x1x128xf32>,
    %c1_i32_182 = arith.constant 1 : i32
    %265 = arith.addi %0, %c1_i32_182 : i32
    %266 = arith.index_cast %265 : i32 to index
    %c4_183 = arith.constant 4 : index
    %267 = memref.load %arg1[%266, %c4_183] : memref<8x8xi32, #tpu.memory_space<smem>>
    %268 = arith.index_cast %267 : i32 to index
    %c0_184 = arith.constant 0 : index
    %269 = vector.load %arg2[%268, %c0_184] : memref<100x128xf32, #tpu.memory_space<vmem>>, vector<1x128xf32>
    %c4_185 = arith.constant 4 : index
    %c1_186 = arith.constant 1 : index
    %c0_187 = arith.constant 0 : index
    %270 = vector.load %arg9[%c4_185, %c1_186, %c0_187] : memref<8x8x128xf32, #tpu.memory_space<vmem>>, vector<1x1x128xf32>
    %271 = vector.shape_cast %270 : vector<1x1x128xf32> to vector<1x128xf32>
    %272 = vector.shape_cast %269 : vector<1x128xf32> to vector<1x1x128xf32>
    tpu.vector_store %arg9[%c4_185, %c1_186, %c0_187], %272 {strides = array<i32>} : memref<8x8x128xf32, #tpu.memory_space<vmem>>, vector<1x1x128xf32>,
    %c2_i32_188 = arith.constant 2 : i32
    %273 = arith.addi %0, %c2_i32_188 : i32
    %274 = arith.index_cast %273 : i32 to index
    %c4_189 = arith.constant 4 : index
    %275 = memref.load %arg1[%274, %c4_189] : memref<8x8xi32, #tpu.memory_space<smem>>
    %276 = arith.index_cast %275 : i32 to index
    %c0_190 = arith.constant 0 : index
    %277 = vector.load %arg2[%276, %c0_190] : memref<100x128xf32, #tpu.memory_space<vmem>>, vector<1x128xf32>
    %c4_191 = arith.constant 4 : index
    %c2_192 = arith.constant 2 : index
    %c0_193 = arith.constant 0 : index
    %278 = vector.load %arg9[%c4_191, %c2_192, %c0_193] : memref<8x8x128xf32, #tpu.memory_space<vmem>>, vector<1x1x128xf32>
    %279 = vector.shape_cast %278 : vector<1x1x128xf32> to vector<1x128xf32>
    %280 = vector.shape_cast %277 : vector<1x128xf32> to vector<1x1x128xf32>
    tpu.vector_store %arg9[%c4_191, %c2_192, %c0_193], %280 {strides = array<i32>} : memref<8x8x128xf32, #tpu.memory_space<vmem>>, vector<1x1x128xf32>,
    %c3_i32_194 = arith.constant 3 : i32
    %281 = arith.addi %0, %c3_i32_194 : i32
    %282 = arith.index_cast %281 : i32 to index
    %c4_195 = arith.constant 4 : index
    %283 = memref.load %arg1[%282, %c4_195] : memref<8x8xi32, #tpu.memory_space<smem>>
    %284 = arith.index_cast %283 : i32 to index
    %c0_196 = arith.constant 0 : index
    %285 = vector.load %arg2[%284, %c0_196] : memref<100x128xf32, #tpu.memory_space<vmem>>, vector<1x128xf32>
    %c4_197 = arith.constant 4 : index
    %c3_198 = arith.constant 3 : index
    %c0_199 = arith.constant 0 : index
    %286 = vector.load %arg9[%c4_197, %c3_198, %c0_199] : memref<8x8x128xf32, #tpu.memory_space<vmem>>, vector<1x1x128xf32>
    %287 = vector.shape_cast %286 : vector<1x1x128xf32> to vector<1x128xf32>
    %288 = vector.shape_cast %285 : vector<1x128xf32> to vector<1x1x128xf32>
    tpu.vector_store %arg9[%c4_197, %c3_198, %c0_199], %288 {strides = array<i32>} : memref<8x8x128xf32, #tpu.memory_space<vmem>>, vector<1x1x128xf32>,
    %c4_i32_200 = arith.constant 4 : i32
    %289 = arith.addi %0, %c4_i32_200 : i32
    %290 = arith.index_cast %289 : i32 to index
    %c4_201 = arith.constant 4 : index
    %291 = memref.load %arg1[%290, %c4_201] : memref<8x8xi32, #tpu.memory_space<smem>>
    %292 = arith.index_cast %291 : i32 to index
    %c0_202 = arith.constant 0 : index
    %293 = vector.load %arg2[%292, %c0_202] : memref<100x128xf32, #tpu.memory_space<vmem>>, vector<1x128xf32>
    %c4_203 = arith.constant 4 : index
    %c4_204 = arith.constant 4 : index
    %c0_205 = arith.constant 0 : index
    %294 = vector.load %arg9[%c4_203, %c4_204, %c0_205] : memref<8x8x128xf32, #tpu.memory_space<vmem>>, vector<1x1x128xf32>
    %295 = vector.shape_cast %294 : vector<1x1x128xf32> to vector<1x128xf32>
    %296 = vector.shape_cast %293 : vector<1x128xf32> to vector<1x1x128xf32>
    tpu.vector_store %arg9[%c4_203, %c4_204, %c0_205], %296 {strides = array<i32>} : memref<8x8x128xf32, #tpu.memory_space<vmem>>, vector<1x1x128xf32>,
    %c5_i32_206 = arith.constant 5 : i32
    %297 = arith.addi %0, %c5_i32_206 : i32
    %298 = arith.index_cast %297 : i32 to index
    %c4_207 = arith.constant 4 : index
    %299 = memref.load %arg1[%298, %c4_207] : memref<8x8xi32, #tpu.memory_space<smem>>
    %300 = arith.index_cast %299 : i32 to index
    %c0_208 = arith.constant 0 : index
    %301 = vector.load %arg2[%300, %c0_208] : memref<100x128xf32, #tpu.memory_space<vmem>>, vector<1x128xf32>
    %c4_209 = arith.constant 4 : index
    %c5_210 = arith.constant 5 : index
    %c0_211 = arith.constant 0 : index
    %302 = vector.load %arg9[%c4_209, %c5_210, %c0_211] : memref<8x8x128xf32, #tpu.memory_space<vmem>>, vector<1x1x128xf32>
    %303 = vector.shape_cast %302 : vector<1x1x128xf32> to vector<1x128xf32>
    %304 = vector.shape_cast %301 : vector<1x128xf32> to vector<1x1x128xf32>
    tpu.vector_store %arg9[%c4_209, %c5_210, %c0_211], %304 {strides = array<i32>} : memref<8x8x128xf32, #tpu.memory_space<vmem>>, vector<1x1x128xf32>,
    %c6_i32_212 = arith.constant 6 : i32
    %305 = arith.addi %0, %c6_i32_212 : i32
    %306 = arith.index_cast %305 : i32 to index
    %c4_213 = arith.constant 4 : index
    %307 = memref.load %arg1[%306, %c4_213] : memref<8x8xi32, #tpu.memory_space<smem>>
    %308 = arith.index_cast %307 : i32 to index
    %c0_214 = arith.constant 0 : index
    %309 = vector.load %arg2[%308, %c0_214] : memref<100x128xf32, #tpu.memory_space<vmem>>, vector<1x128xf32>
    %c4_215 = arith.constant 4 : index
    %c6_216 = arith.constant 6 : index
    %c0_217 = arith.constant 0 : index
    %310 = vector.load %arg9[%c4_215, %c6_216, %c0_217] : memref<8x8x128xf32, #tpu.memory_space<vmem>>, vector<1x1x128xf32>
    %311 = vector.shape_cast %310 : vector<1x1x128xf32> to vector<1x128xf32>
    %312 = vector.shape_cast %309 : vector<1x128xf32> to vector<1x1x128xf32>
    tpu.vector_store %arg9[%c4_215, %c6_216, %c0_217], %312 {strides = array<i32>} : memref<8x8x128xf32, #tpu.memory_space<vmem>>, vector<1x1x128xf32>,
    %c7_i32_218 = arith.constant 7 : i32
    %313 = arith.addi %0, %c7_i32_218 : i32
    %314 = arith.index_cast %313 : i32 to index
    %c4_219 = arith.constant 4 : index
    %315 = memref.load %arg1[%314, %c4_219] : memref<8x8xi32, #tpu.memory_space<smem>>
    %316 = arith.index_cast %315 : i32 to index
    %c0_220 = arith.constant 0 : index
    %317 = vector.load %arg2[%316, %c0_220] : memref<100x128xf32, #tpu.memory_space<vmem>>, vector<1x128xf32>
    %c4_221 = arith.constant 4 : index
    %c7_222 = arith.constant 7 : index
    %c0_223 = arith.constant 0 : index
    %318 = vector.load %arg9[%c4_221, %c7_222, %c0_223] : memref<8x8x128xf32, #tpu.memory_space<vmem>>, vector<1x1x128xf32>
    %319 = vector.shape_cast %318 : vector<1x1x128xf32> to vector<1x128xf32>
    %320 = vector.shape_cast %317 : vector<1x128xf32> to vector<1x1x128xf32>
    tpu.vector_store %arg9[%c4_221, %c7_222, %c0_223], %320 {strides = array<i32>} : memref<8x8x128xf32, #tpu.memory_space<vmem>>, vector<1x1x128xf32>,
    %c0_i32_224 = arith.constant 0 : i32
    %321 = arith.addi %0, %c0_i32_224 : i32
    %322 = arith.index_cast %321 : i32 to index
    %c5_225 = arith.constant 5 : index
    %323 = memref.load %arg1[%322, %c5_225] : memref<8x8xi32, #tpu.memory_space<smem>>
    %324 = arith.index_cast %323 : i32 to index
    %c0_226 = arith.constant 0 : index
    %325 = vector.load %arg2[%324, %c0_226] : memref<100x128xf32, #tpu.memory_space<vmem>>, vector<1x128xf32>
    %c5_227 = arith.constant 5 : index
    %c0_228 = arith.constant 0 : index
    %c0_229 = arith.constant 0 : index
    %326 = vector.load %arg9[%c5_227, %c0_228, %c0_229] : memref<8x8x128xf32, #tpu.memory_space<vmem>>, vector<1x1x128xf32>
    %327 = vector.shape_cast %326 : vector<1x1x128xf32> to vector<1x128xf32>
    %328 = vector.shape_cast %325 : vector<1x128xf32> to vector<1x1x128xf32>
    tpu.vector_store %arg9[%c5_227, %c0_228, %c0_229], %328 {strides = array<i32>} : memref<8x8x128xf32, #tpu.memory_space<vmem>>, vector<1x1x128xf32>,
    %c1_i32_230 = arith.constant 1 : i32
    %329 = arith.addi %0, %c1_i32_230 : i32
    %330 = arith.index_cast %329 : i32 to index
    %c5_231 = arith.constant 5 : index
    %331 = memref.load %arg1[%330, %c5_231] : memref<8x8xi32, #tpu.memory_space<smem>>
    %332 = arith.index_cast %331 : i32 to index
    %c0_232 = arith.constant 0 : index
    %333 = vector.load %arg2[%332, %c0_232] : memref<100x128xf32, #tpu.memory_space<vmem>>, vector<1x128xf32>
    %c5_233 = arith.constant 5 : index
    %c1_234 = arith.constant 1 : index
    %c0_235 = arith.constant 0 : index
    %334 = vector.load %arg9[%c5_233, %c1_234, %c0_235] : memref<8x8x128xf32, #tpu.memory_space<vmem>>, vector<1x1x128xf32>
    %335 = vector.shape_cast %334 : vector<1x1x128xf32> to vector<1x128xf32>
    %336 = vector.shape_cast %333 : vector<1x128xf32> to vector<1x1x128xf32>
    tpu.vector_store %arg9[%c5_233, %c1_234, %c0_235], %336 {strides = array<i32>} : memref<8x8x128xf32, #tpu.memory_space<vmem>>, vector<1x1x128xf32>,
    %c2_i32_236 = arith.constant 2 : i32
    %337 = arith.addi %0, %c2_i32_236 : i32
    %338 = arith.index_cast %337 : i32 to index
    %c5_237 = arith.constant 5 : index
    %339 = memref.load %arg1[%338, %c5_237] : memref<8x8xi32, #tpu.memory_space<smem>>
    %340 = arith.index_cast %339 : i32 to index
    %c0_238 = arith.constant 0 : index
    %341 = vector.load %arg2[%340, %c0_238] : memref<100x128xf32, #tpu.memory_space<vmem>>, vector<1x128xf32>
    %c5_239 = arith.constant 5 : index
    %c2_240 = arith.constant 2 : index
    %c0_241 = arith.constant 0 : index
    %342 = vector.load %arg9[%c5_239, %c2_240, %c0_241] : memref<8x8x128xf32, #tpu.memory_space<vmem>>, vector<1x1x128xf32>
    %343 = vector.shape_cast %342 : vector<1x1x128xf32> to vector<1x128xf32>
    %344 = vector.shape_cast %341 : vector<1x128xf32> to vector<1x1x128xf32>
    tpu.vector_store %arg9[%c5_239, %c2_240, %c0_241], %344 {strides = array<i32>} : memref<8x8x128xf32, #tpu.memory_space<vmem>>, vector<1x1x128xf32>,
    %c3_i32_242 = arith.constant 3 : i32
    %345 = arith.addi %0, %c3_i32_242 : i32
    %346 = arith.index_cast %345 : i32 to index
    %c5_243 = arith.constant 5 : index
    %347 = memref.load %arg1[%346, %c5_243] : memref<8x8xi32, #tpu.memory_space<smem>>
    %348 = arith.index_cast %347 : i32 to index
    %c0_244 = arith.constant 0 : index
    %349 = vector.load %arg2[%348, %c0_244] : memref<100x128xf32, #tpu.memory_space<vmem>>, vector<1x128xf32>
    %c5_245 = arith.constant 5 : index
    %c3_246 = arith.constant 3 : index
    %c0_247 = arith.constant 0 : index
    %350 = vector.load %arg9[%c5_245, %c3_246, %c0_247] : memref<8x8x128xf32, #tpu.memory_space<vmem>>, vector<1x1x128xf32>
    %351 = vector.shape_cast %350 : vector<1x1x128xf32> to vector<1x128xf32>
    %352 = vector.shape_cast %349 : vector<1x128xf32> to vector<1x1x128xf32>
    tpu.vector_store %arg9[%c5_245, %c3_246, %c0_247], %352 {strides = array<i32>} : memref<8x8x128xf32, #tpu.memory_space<vmem>>, vector<1x1x128xf32>,
    %c4_i32_248 = arith.constant 4 : i32
    %353 = arith.addi %0, %c4_i32_248 : i32
    %354 = arith.index_cast %353 : i32 to index
    %c5_249 = arith.constant 5 : index
    %355 = memref.load %arg1[%354, %c5_249] : memref<8x8xi32, #tpu.memory_space<smem>>
    %356 = arith.index_cast %355 : i32 to index
    %c0_250 = arith.constant 0 : index
    %357 = vector.load %arg2[%356, %c0_250] : memref<100x128xf32, #tpu.memory_space<vmem>>, vector<1x128xf32>
    %c5_251 = arith.constant 5 : index
    %c4_252 = arith.constant 4 : index
    %c0_253 = arith.constant 0 : index
    %358 = vector.load %arg9[%c5_251, %c4_252, %c0_253] : memref<8x8x128xf32, #tpu.memory_space<vmem>>, vector<1x1x128xf32>
    %359 = vector.shape_cast %358 : vector<1x1x128xf32> to vector<1x128xf32>
    %360 = vector.shape_cast %357 : vector<1x128xf32> to vector<1x1x128xf32>
    tpu.vector_store %arg9[%c5_251, %c4_252, %c0_253], %360 {strides = array<i32>} : memref<8x8x128xf32, #tpu.memory_space<vmem>>, vector<1x1x128xf32>,
    %c5_i32_254 = arith.constant 5 : i32
    %361 = arith.addi %0, %c5_i32_254 : i32
    %362 = arith.index_cast %361 : i32 to index
    %c5_255 = arith.constant 5 : index
    %363 = memref.load %arg1[%362, %c5_255] : memref<8x8xi32, #tpu.memory_space<smem>>
    %364 = arith.index_cast %363 : i32 to index
    %c0_256 = arith.constant 0 : index
    %365 = vector.load %arg2[%364, %c0_256] : memref<100x128xf32, #tpu.memory_space<vmem>>, vector<1x128xf32>
    %c5_257 = arith.constant 5 : index
    %c5_258 = arith.constant 5 : index
    %c0_259 = arith.constant 0 : index
    %366 = vector.load %arg9[%c5_257, %c5_258, %c0_259] : memref<8x8x128xf32, #tpu.memory_space<vmem>>, vector<1x1x128xf32>
    %367 = vector.shape_cast %366 : vector<1x1x128xf32> to vector<1x128xf32>
    %368 = vector.shape_cast %365 : vector<1x128xf32> to vector<1x1x128xf32>
    tpu.vector_store %arg9[%c5_257, %c5_258, %c0_259], %368 {strides = array<i32>} : memref<8x8x128xf32, #tpu.memory_space<vmem>>, vector<1x1x128xf32>,
    %c6_i32_260 = arith.constant 6 : i32
    %369 = arith.addi %0, %c6_i32_260 : i32
    %370 = arith.index_cast %369 : i32 to index
    %c5_261 = arith.constant 5 : index
    %371 = memref.load %arg1[%370, %c5_261] : memref<8x8xi32, #tpu.memory_space<smem>>
    %372 = arith.index_cast %371 : i32 to index
    %c0_262 = arith.constant 0 : index
    %373 = vector.load %arg2[%372, %c0_262] : memref<100x128xf32, #tpu.memory_space<vmem>>, vector<1x128xf32>
    %c5_263 = arith.constant 5 : index
    %c6_264 = arith.constant 6 : index
    %c0_265 = arith.constant 0 : index
    %374 = vector.load %arg9[%c5_263, %c6_264, %c0_265] : memref<8x8x128xf32, #tpu.memory_space<vmem>>, vector<1x1x128xf32>
    %375 = vector.shape_cast %374 : vector<1x1x128xf32> to vector<1x128xf32>
    %376 = vector.shape_cast %373 : vector<1x128xf32> to vector<1x1x128xf32>
    tpu.vector_store %arg9[%c5_263, %c6_264, %c0_265], %376 {strides = array<i32>} : memref<8x8x128xf32, #tpu.memory_space<vmem>>, vector<1x1x128xf32>,
    %c7_i32_266 = arith.constant 7 : i32
    %377 = arith.addi %0, %c7_i32_266 : i32
    %378 = arith.index_cast %377 : i32 to index
    %c5_267 = arith.constant 5 : index
    %379 = memref.load %arg1[%378, %c5_267] : memref<8x8xi32, #tpu.memory_space<smem>>
    %380 = arith.index_cast %379 : i32 to index
    %c0_268 = arith.constant 0 : index
    %381 = vector.load %arg2[%380, %c0_268] : memref<100x128xf32, #tpu.memory_space<vmem>>, vector<1x128xf32>
    %c5_269 = arith.constant 5 : index
    %c7_270 = arith.constant 7 : index
    %c0_271 = arith.constant 0 : index
    %382 = vector.load %arg9[%c5_269, %c7_270, %c0_271] : memref<8x8x128xf32, #tpu.memory_space<vmem>>, vector<1x1x128xf32>
    %383 = vector.shape_cast %382 : vector<1x1x128xf32> to vector<1x128xf32>
    %384 = vector.shape_cast %381 : vector<1x128xf32> to vector<1x1x128xf32>
    tpu.vector_store %arg9[%c5_269, %c7_270, %c0_271], %384 {strides = array<i32>} : memref<8x8x128xf32, #tpu.memory_space<vmem>>, vector<1x1x128xf32>,
    %c0_i32_272 = arith.constant 0 : i32
    %385 = arith.addi %0, %c0_i32_272 : i32
    %386 = arith.index_cast %385 : i32 to index
    %c6_273 = arith.constant 6 : index
    %387 = memref.load %arg1[%386, %c6_273] : memref<8x8xi32, #tpu.memory_space<smem>>
    %388 = arith.index_cast %387 : i32 to index
    %c0_274 = arith.constant 0 : index
    %389 = vector.load %arg2[%388, %c0_274] : memref<100x128xf32, #tpu.memory_space<vmem>>, vector<1x128xf32>
    %c6_275 = arith.constant 6 : index
    %c0_276 = arith.constant 0 : index
    %c0_277 = arith.constant 0 : index
    %390 = vector.load %arg9[%c6_275, %c0_276, %c0_277] : memref<8x8x128xf32, #tpu.memory_space<vmem>>, vector<1x1x128xf32>
    %391 = vector.shape_cast %390 : vector<1x1x128xf32> to vector<1x128xf32>
    %392 = vector.shape_cast %389 : vector<1x128xf32> to vector<1x1x128xf32>
    tpu.vector_store %arg9[%c6_275, %c0_276, %c0_277], %392 {strides = array<i32>} : memref<8x8x128xf32, #tpu.memory_space<vmem>>, vector<1x1x128xf32>,
    %c1_i32_278 = arith.constant 1 : i32
    %393 = arith.addi %0, %c1_i32_278 : i32
    %394 = arith.index_cast %393 : i32 to index
    %c6_279 = arith.constant 6 : index
    %395 = memref.load %arg1[%394, %c6_279] : memref<8x8xi32, #tpu.memory_space<smem>>
    %396 = arith.index_cast %395 : i32 to index
    %c0_280 = arith.constant 0 : index
    %397 = vector.load %arg2[%396, %c0_280] : memref<100x128xf32, #tpu.memory_space<vmem>>, vector<1x128xf32>
    %c6_281 = arith.constant 6 : index
    %c1_282 = arith.constant 1 : index
    %c0_283 = arith.constant 0 : index
    %398 = vector.load %arg9[%c6_281, %c1_282, %c0_283] : memref<8x8x128xf32, #tpu.memory_space<vmem>>, vector<1x1x128xf32>
    %399 = vector.shape_cast %398 : vector<1x1x128xf32> to vector<1x128xf32>
    %400 = vector.shape_cast %397 : vector<1x128xf32> to vector<1x1x128xf32>
    tpu.vector_store %arg9[%c6_281, %c1_282, %c0_283], %400 {strides = array<i32>} : memref<8x8x128xf32, #tpu.memory_space<vmem>>, vector<1x1x128xf32>,
    %c2_i32_284 = arith.constant 2 : i32
    %401 = arith.addi %0, %c2_i32_284 : i32
    %402 = arith.index_cast %401 : i32 to index
    %c6_285 = arith.constant 6 : index
    %403 = memref.load %arg1[%402, %c6_285] : memref<8x8xi32, #tpu.memory_space<smem>>
    %404 = arith.index_cast %403 : i32 to index
    %c0_286 = arith.constant 0 : index
    %405 = vector.load %arg2[%404, %c0_286] : memref<100x128xf32, #tpu.memory_space<vmem>>, vector<1x128xf32>
    %c6_287 = arith.constant 6 : index
    %c2_288 = arith.constant 2 : index
    %c0_289 = arith.constant 0 : index
    %406 = vector.load %arg9[%c6_287, %c2_288, %c0_289] : memref<8x8x128xf32, #tpu.memory_space<vmem>>, vector<1x1x128xf32>
    %407 = vector.shape_cast %406 : vector<1x1x128xf32> to vector<1x128xf32>
    %408 = vector.shape_cast %405 : vector<1x128xf32> to vector<1x1x128xf32>
    tpu.vector_store %arg9[%c6_287, %c2_288, %c0_289], %408 {strides = array<i32>} : memref<8x8x128xf32, #tpu.memory_space<vmem>>, vector<1x1x128xf32>,
    %c3_i32_290 = arith.constant 3 : i32
    %409 = arith.addi %0, %c3_i32_290 : i32
    %410 = arith.index_cast %409 : i32 to index
    %c6_291 = arith.constant 6 : index
    %411 = memref.load %arg1[%410, %c6_291] : memref<8x8xi32, #tpu.memory_space<smem>>
    %412 = arith.index_cast %411 : i32 to index
    %c0_292 = arith.constant 0 : index
    %413 = vector.load %arg2[%412, %c0_292] : memref<100x128xf32, #tpu.memory_space<vmem>>, vector<1x128xf32>
    %c6_293 = arith.constant 6 : index
    %c3_294 = arith.constant 3 : index
    %c0_295 = arith.constant 0 : index
    %414 = vector.load %arg9[%c6_293, %c3_294, %c0_295] : memref<8x8x128xf32, #tpu.memory_space<vmem>>, vector<1x1x128xf32>
    %415 = vector.shape_cast %414 : vector<1x1x128xf32> to vector<1x128xf32>
    %416 = vector.shape_cast %413 : vector<1x128xf32> to vector<1x1x128xf32>
    tpu.vector_store %arg9[%c6_293, %c3_294, %c0_295], %416 {strides = array<i32>} : memref<8x8x128xf32, #tpu.memory_space<vmem>>, vector<1x1x128xf32>,
    %c4_i32_296 = arith.constant 4 : i32
    %417 = arith.addi %0, %c4_i32_296 : i32
    %418 = arith.index_cast %417 : i32 to index
    %c6_297 = arith.constant 6 : index
    %419 = memref.load %arg1[%418, %c6_297] : memref<8x8xi32, #tpu.memory_space<smem>>
    %420 = arith.index_cast %419 : i32 to index
    %c0_298 = arith.constant 0 : index
    %421 = vector.load %arg2[%420, %c0_298] : memref<100x128xf32, #tpu.memory_space<vmem>>, vector<1x128xf32>
    %c6_299 = arith.constant 6 : index
    %c4_300 = arith.constant 4 : index
    %c0_301 = arith.constant 0 : index
    %422 = vector.load %arg9[%c6_299, %c4_300, %c0_301] : memref<8x8x128xf32, #tpu.memory_space<vmem>>, vector<1x1x128xf32>
    %423 = vector.shape_cast %422 : vector<1x1x128xf32> to vector<1x128xf32>
    %424 = vector.shape_cast %421 : vector<1x128xf32> to vector<1x1x128xf32>
    tpu.vector_store %arg9[%c6_299, %c4_300, %c0_301], %424 {strides = array<i32>} : memref<8x8x128xf32, #tpu.memory_space<vmem>>, vector<1x1x128xf32>,
    %c5_i32_302 = arith.constant 5 : i32
    %425 = arith.addi %0, %c5_i32_302 : i32
    %426 = arith.index_cast %425 : i32 to index
    %c6_303 = arith.constant 6 : index
    %427 = memref.load %arg1[%426, %c6_303] : memref<8x8xi32, #tpu.memory_space<smem>>
    %428 = arith.index_cast %427 : i32 to index
    %c0_304 = arith.constant 0 : index
    %429 = vector.load %arg2[%428, %c0_304] : memref<100x128xf32, #tpu.memory_space<vmem>>, vector<1x128xf32>
    %c6_305 = arith.constant 6 : index
    %c5_306 = arith.constant 5 : index
    %c0_307 = arith.constant 0 : index
    %430 = vector.load %arg9[%c6_305, %c5_306, %c0_307] : memref<8x8x128xf32, #tpu.memory_space<vmem>>, vector<1x1x128xf32>
    %431 = vector.shape_cast %430 : vector<1x1x128xf32> to vector<1x128xf32>
    %432 = vector.shape_cast %429 : vector<1x128xf32> to vector<1x1x128xf32>
    tpu.vector_store %arg9[%c6_305, %c5_306, %c0_307], %432 {strides = array<i32>} : memref<8x8x128xf32, #tpu.memory_space<vmem>>, vector<1x1x128xf32>,
    %c6_i32_308 = arith.constant 6 : i32
    %433 = arith.addi %0, %c6_i32_308 : i32
    %434 = arith.index_cast %433 : i32 to index
    %c6_309 = arith.constant 6 : index
    %435 = memref.load %arg1[%434, %c6_309] : memref<8x8xi32, #tpu.memory_space<smem>>
    %436 = arith.index_cast %435 : i32 to index
    %c0_310 = arith.constant 0 : index
    %437 = vector.load %arg2[%436, %c0_310] : memref<100x128xf32, #tpu.memory_space<vmem>>, vector<1x128xf32>
    %c6_311 = arith.constant 6 : index
    %c6_312 = arith.constant 6 : index
    %c0_313 = arith.constant 0 : index
    %438 = vector.load %arg9[%c6_311, %c6_312, %c0_313] : memref<8x8x128xf32, #tpu.memory_space<vmem>>, vector<1x1x128xf32>
    %439 = vector.shape_cast %438 : vector<1x1x128xf32> to vector<1x128xf32>
    %440 = vector.shape_cast %437 : vector<1x128xf32> to vector<1x1x128xf32>
    tpu.vector_store %arg9[%c6_311, %c6_312, %c0_313], %440 {strides = array<i32>} : memref<8x8x128xf32, #tpu.memory_space<vmem>>, vector<1x1x128xf32>,
    %c7_i32_314 = arith.constant 7 : i32
    %441 = arith.addi %0, %c7_i32_314 : i32
    %442 = arith.index_cast %441 : i32 to index
    %c6_315 = arith.constant 6 : index
    %443 = memref.load %arg1[%442, %c6_315] : memref<8x8xi32, #tpu.memory_space<smem>>
    %444 = arith.index_cast %443 : i32 to index
    %c0_316 = arith.constant 0 : index
    %445 = vector.load %arg2[%444, %c0_316] : memref<100x128xf32, #tpu.memory_space<vmem>>, vector<1x128xf32>
    %c6_317 = arith.constant 6 : index
    %c7_318 = arith.constant 7 : index
    %c0_319 = arith.constant 0 : index
    %446 = vector.load %arg9[%c6_317, %c7_318, %c0_319] : memref<8x8x128xf32, #tpu.memory_space<vmem>>, vector<1x1x128xf32>
    %447 = vector.shape_cast %446 : vector<1x1x128xf32> to vector<1x128xf32>
    %448 = vector.shape_cast %445 : vector<1x128xf32> to vector<1x1x128xf32>
    tpu.vector_store %arg9[%c6_317, %c7_318, %c0_319], %448 {strides = array<i32>} : memref<8x8x128xf32, #tpu.memory_space<vmem>>, vector<1x1x128xf32>,
    %c0_i32_320 = arith.constant 0 : i32
    %449 = arith.addi %0, %c0_i32_320 : i32
    %450 = arith.index_cast %449 : i32 to index
    %c7_321 = arith.constant 7 : index
    %451 = memref.load %arg1[%450, %c7_321] : memref<8x8xi32, #tpu.memory_space<smem>>
    %452 = arith.index_cast %451 : i32 to index
    %c0_322 = arith.constant 0 : index
    %453 = vector.load %arg2[%452, %c0_322] : memref<100x128xf32, #tpu.memory_space<vmem>>, vector<1x128xf32>
    %c7_323 = arith.constant 7 : index
    %c0_324 = arith.constant 0 : index
    %c0_325 = arith.constant 0 : index
    %454 = vector.load %arg9[%c7_323, %c0_324, %c0_325] : memref<8x8x128xf32, #tpu.memory_space<vmem>>, vector<1x1x128xf32>
    %455 = vector.shape_cast %454 : vector<1x1x128xf32> to vector<1x128xf32>
    %456 = vector.shape_cast %453 : vector<1x128xf32> to vector<1x1x128xf32>
    tpu.vector_store %arg9[%c7_323, %c0_324, %c0_325], %456 {strides = array<i32>} : memref<8x8x128xf32, #tpu.memory_space<vmem>>, vector<1x1x128xf32>,
    %c1_i32_326 = arith.constant 1 : i32
    %457 = arith.addi %0, %c1_i32_326 : i32
    %458 = arith.index_cast %457 : i32 to index
    %c7_327 = arith.constant 7 : index
    %459 = memref.load %arg1[%458, %c7_327] : memref<8x8xi32, #tpu.memory_space<smem>>
    %460 = arith.index_cast %459 : i32 to index
    %c0_328 = arith.constant 0 : index
    %461 = vector.load %arg2[%460, %c0_328] : memref<100x128xf32, #tpu.memory_space<vmem>>, vector<1x128xf32>
    %c7_329 = arith.constant 7 : index
    %c1_330 = arith.constant 1 : index
    %c0_331 = arith.constant 0 : index
    %462 = vector.load %arg9[%c7_329, %c1_330, %c0_331] : memref<8x8x128xf32, #tpu.memory_space<vmem>>, vector<1x1x128xf32>
    %463 = vector.shape_cast %462 : vector<1x1x128xf32> to vector<1x128xf32>
    %464 = vector.shape_cast %461 : vector<1x128xf32> to vector<1x1x128xf32>
    tpu.vector_store %arg9[%c7_329, %c1_330, %c0_331], %464 {strides = array<i32>} : memref<8x8x128xf32, #tpu.memory_space<vmem>>, vector<1x1x128xf32>,
    %c2_i32_332 = arith.constant 2 : i32
    %465 = arith.addi %0, %c2_i32_332 : i32
    %466 = arith.index_cast %465 : i32 to index
    %c7_333 = arith.constant 7 : index
    %467 = memref.load %arg1[%466, %c7_333] : memref<8x8xi32, #tpu.memory_space<smem>>
    %468 = arith.index_cast %467 : i32 to index
    %c0_334 = arith.constant 0 : index
    %469 = vector.load %arg2[%468, %c0_334] : memref<100x128xf32, #tpu.memory_space<vmem>>, vector<1x128xf32>
    %c7_335 = arith.constant 7 : index
    %c2_336 = arith.constant 2 : index
    %c0_337 = arith.constant 0 : index
    %470 = vector.load %arg9[%c7_335, %c2_336, %c0_337] : memref<8x8x128xf32, #tpu.memory_space<vmem>>, vector<1x1x128xf32>
    %471 = vector.shape_cast %470 : vector<1x1x128xf32> to vector<1x128xf32>
    %472 = vector.shape_cast %469 : vector<1x128xf32> to vector<1x1x128xf32>
    tpu.vector_store %arg9[%c7_335, %c2_336, %c0_337], %472 {strides = array<i32>} : memref<8x8x128xf32, #tpu.memory_space<vmem>>, vector<1x1x128xf32>,
    %c3_i32_338 = arith.constant 3 : i32
    %473 = arith.addi %0, %c3_i32_338 : i32
    %474 = arith.index_cast %473 : i32 to index
    %c7_339 = arith.constant 7 : index
    %475 = memref.load %arg1[%474, %c7_339] : memref<8x8xi32, #tpu.memory_space<smem>>
    %476 = arith.index_cast %475 : i32 to index
    %c0_340 = arith.constant 0 : index
    %477 = vector.load %arg2[%476, %c0_340] : memref<100x128xf32, #tpu.memory_space<vmem>>, vector<1x128xf32>
    %c7_341 = arith.constant 7 : index
    %c3_342 = arith.constant 3 : index
    %c0_343 = arith.constant 0 : index
    %478 = vector.load %arg9[%c7_341, %c3_342, %c0_343] : memref<8x8x128xf32, #tpu.memory_space<vmem>>, vector<1x1x128xf32>
    %479 = vector.shape_cast %478 : vector<1x1x128xf32> to vector<1x128xf32>
    %480 = vector.shape_cast %477 : vector<1x128xf32> to vector<1x1x128xf32>
    tpu.vector_store %arg9[%c7_341, %c3_342, %c0_343], %480 {strides = array<i32>} : memref<8x8x128xf32, #tpu.memory_space<vmem>>, vector<1x1x128xf32>,
    %c4_i32_344 = arith.constant 4 : i32
    %481 = arith.addi %0, %c4_i32_344 : i32
    %482 = arith.index_cast %481 : i32 to index
    %c7_345 = arith.constant 7 : index
    %483 = memref.load %arg1[%482, %c7_345] : memref<8x8xi32, #tpu.memory_space<smem>>
    %484 = arith.index_cast %483 : i32 to index
    %c0_346 = arith.constant 0 : index
    %485 = vector.load %arg2[%484, %c0_346] : memref<100x128xf32, #tpu.memory_space<vmem>>, vector<1x128xf32>
    %c7_347 = arith.constant 7 : index
    %c4_348 = arith.constant 4 : index
    %c0_349 = arith.constant 0 : index
    %486 = vector.load %arg9[%c7_347, %c4_348, %c0_349] : memref<8x8x128xf32, #tpu.memory_space<vmem>>, vector<1x1x128xf32>
    %487 = vector.shape_cast %486 : vector<1x1x128xf32> to vector<1x128xf32>
    %488 = vector.shape_cast %485 : vector<1x128xf32> to vector<1x1x128xf32>
    tpu.vector_store %arg9[%c7_347, %c4_348, %c0_349], %488 {strides = array<i32>} : memref<8x8x128xf32, #tpu.memory_space<vmem>>, vector<1x1x128xf32>,
    %c5_i32_350 = arith.constant 5 : i32
    %489 = arith.addi %0, %c5_i32_350 : i32
    %490 = arith.index_cast %489 : i32 to index
    %c7_351 = arith.constant 7 : index
    %491 = memref.load %arg1[%490, %c7_351] : memref<8x8xi32, #tpu.memory_space<smem>>
    %492 = arith.index_cast %491 : i32 to index
    %c0_352 = arith.constant 0 : index
    %493 = vector.load %arg2[%492, %c0_352] : memref<100x128xf32, #tpu.memory_space<vmem>>, vector<1x128xf32>
    %c7_353 = arith.constant 7 : index
    %c5_354 = arith.constant 5 : index
    %c0_355 = arith.constant 0 : index
    %494 = vector.load %arg9[%c7_353, %c5_354, %c0_355] : memref<8x8x128xf32, #tpu.memory_space<vmem>>, vector<1x1x128xf32>
    %495 = vector.shape_cast %494 : vector<1x1x128xf32> to vector<1x128xf32>
    %496 = vector.shape_cast %493 : vector<1x128xf32> to vector<1x1x128xf32>
    tpu.vector_store %arg9[%c7_353, %c5_354, %c0_355], %496 {strides = array<i32>} : memref<8x8x128xf32, #tpu.memory_space<vmem>>, vector<1x1x128xf32>,
    %c6_i32_356 = arith.constant 6 : i32
    %497 = arith.addi %0, %c6_i32_356 : i32
    %498 = arith.index_cast %497 : i32 to index
    %c7_357 = arith.constant 7 : index
    %499 = memref.load %arg1[%498, %c7_357] : memref<8x8xi32, #tpu.memory_space<smem>>
    %500 = arith.index_cast %499 : i32 to index
    %c0_358 = arith.constant 0 : index
    %501 = vector.load %arg2[%500, %c0_358] : memref<100x128xf32, #tpu.memory_space<vmem>>, vector<1x128xf32>
    %c7_359 = arith.constant 7 : index
    %c6_360 = arith.constant 6 : index
    %c0_361 = arith.constant 0 : index
    %502 = vector.load %arg9[%c7_359, %c6_360, %c0_361] : memref<8x8x128xf32, #tpu.memory_space<vmem>>, vector<1x1x128xf32>
    %503 = vector.shape_cast %502 : vector<1x1x128xf32> to vector<1x128xf32>
    %504 = vector.shape_cast %501 : vector<1x128xf32> to vector<1x1x128xf32>
    tpu.vector_store %arg9[%c7_359, %c6_360, %c0_361], %504 {strides = array<i32>} : memref<8x8x128xf32, #tpu.memory_space<vmem>>, vector<1x1x128xf32>,
    %c7_i32_362 = arith.constant 7 : i32
    %505 = arith.addi %0, %c7_i32_362 : i32
    %506 = arith.index_cast %505 : i32 to index
    %c7_363 = arith.constant 7 : index
    %507 = memref.load %arg1[%506, %c7_363] : memref<8x8xi32, #tpu.memory_space<smem>>
    %508 = arith.index_cast %507 : i32 to index
    %c0_364 = arith.constant 0 : index
    %509 = vector.load %arg2[%508, %c0_364] : memref<100x128xf32, #tpu.memory_space<vmem>>, vector<1x128xf32>
    %c7_365 = arith.constant 7 : index
    %c7_366 = arith.constant 7 : index
    %c0_367 = arith.constant 0 : index
    %510 = vector.load %arg9[%c7_365, %c7_366, %c0_367] : memref<8x8x128xf32, #tpu.memory_space<vmem>>, vector<1x1x128xf32>
    %511 = vector.shape_cast %510 : vector<1x1x128xf32> to vector<1x128xf32>
    %512 = vector.shape_cast %509 : vector<1x128xf32> to vector<1x1x128xf32>
    tpu.vector_store %arg9[%c7_365, %c7_366, %c0_367], %512 {strides = array<i32>} : memref<8x8x128xf32, #tpu.memory_space<vmem>>, vector<1x1x128xf32>,
    %cst = arith.constant 0.000000e+00 : f32
    %513 = vector.broadcast %cst : f32 to vector<8x32xf32>
    %c0_368 = arith.constant 0 : index
    %c0_369 = arith.constant 0 : index
    %514 = vector.load %arg7[%c0_368, %c0_369] : memref<8x32xf32, #tpu.memory_space<vmem>>, vector<8x32xf32>
    tpu.vector_store %arg7[%c0_368, %c0_369], %513 {strides = array<i32>} : memref<8x32xf32, #tpu.memory_space<vmem>>, vector<8x32xf32>,
    %cst_370 = arith.constant 0.000000e+00 : f32
    %515 = vector.broadcast %cst_370 : f32 to vector<8x32xf32>
    %c0_371 = arith.constant 0 : index
    %c0_372 = arith.constant 0 : index
    %516 = vector.load %arg8[%c0_371, %c0_372] : memref<8x32xf32, #tpu.memory_space<vmem>>, vector<8x32xf32>
    tpu.vector_store %arg8[%c0_371, %c0_372], %515 {strides = array<i32>} : memref<8x32xf32, #tpu.memory_space<vmem>>, vector<8x32xf32>,
    %517 = tpu.iota {dimensions = array<i32: 1>} : vector<8x128xi32>
    %c64_i32 = arith.constant 64 : i32
    %518 = vector.broadcast %c64_i32 : i32 to vector<8x128xi32>
    %519 = arith.cmpi sge, %517, %518 : vector<8x128xi32>
    %c96_i32 = arith.constant 96 : i32
    %520 = vector.broadcast %c96_i32 : i32 to vector<8x128xi32>
    %521 = arith.cmpi slt, %517, %520 : vector<8x128xi32>
    %522 = arith.andi %519, %521 : vector<8x128xi1>
    %c0_i32_373 = arith.constant 0 : i32
    %523 = arith.index_cast %c0_i32_373 : i32 to index
    %c0_374 = arith.constant 0 : index
    %c0_375 = arith.constant 0 : index
    %524 = vector.load %arg9[%523, %c0_374, %c0_375] : memref<8x8x128xf32, #tpu.memory_space<vmem>>, vector<1x8x128xf32>
    %525 = vector.shape_cast %524 : vector<1x8x128xf32> to vector<8x128xf32>
    %c0_376 = arith.constant 0 : index
    %c0_377 = arith.constant 0 : index
    %526 = vector.load %arg7[%c0_376, %c0_377] : memref<8x32xf32, #tpu.memory_space<vmem>>, vector<8x32xf32>
    %c0_378 = arith.constant 0 : index
    %c0_379 = arith.constant 0 : index
    %527 = vector.load %arg3[%c0_378, %c0_379] : memref<32x128xf32, #tpu.memory_space<vmem>>, vector<32x128xf32>
    %cst_380 = arith.constant dense<0.000000e+00> : vector<8x128xf32>
    %528 = tpu.matmul %526, %527, %cst_380 {dimension_numbers = #tpu.dot_dimension_numbers<[1], [0], [0], [1], [0, 0, 1, 1], [], []>} : vector<8x32xf32>, vector<32x128xf32>, vector<8x128xf32> -> vector<8x128xf32>
    %529 = arith.addf %525, %528 : vector<8x128xf32>
    %530 = math.tanh %529 : vector<8x128xf32>
    %531 = arith.negf %529 : vector<8x128xf32>
    %532 = math.exp %531 : vector<8x128xf32>
    %cst_381 = arith.constant 1.000000e+00 : f32
    %533 = vector.broadcast %cst_381 : f32 to vector<8x128xf32>
    %534 = arith.addf %533, %532 : vector<8x128xf32>
    %535 = arith.divf %533, %534 : vector<8x128xf32>
    %536 = arith.select %522, %530, %535 : vector<8x128xi1>, vector<8x128xf32>
    %537 = vector.extract_strided_slice %536 {offsets = [0, 0], sizes = [8, 32], strides = [1, 1]} : vector<8x128xf32> to vector<8x32xf32>
    %538 = vector.extract_strided_slice %536 {offsets = [0, 32], sizes = [8, 32], strides = [1, 1]} : vector<8x128xf32> to vector<8x32xf32>
    %539 = vector.extract_strided_slice %536 {offsets = [0, 64], sizes = [8, 32], strides = [1, 1]} : vector<8x128xf32> to vector<8x32xf32>
    %540 = vector.extract_strided_slice %536 {offsets = [0, 96], sizes = [8, 32], strides = [1, 1]} : vector<8x128xf32> to vector<8x32xf32>
    %c0_382 = arith.constant 0 : index
    %c0_383 = arith.constant 0 : index
    %541 = vector.load %arg8[%c0_382, %c0_383] : memref<8x32xf32, #tpu.memory_space<vmem>>, vector<8x32xf32>
    %542 = arith.mulf %538, %541 : vector<8x32xf32>
    %543 = arith.mulf %537, %539 : vector<8x32xf32>
    %544 = arith.addf %542, %543 : vector<8x32xf32>
    %545 = math.tanh %544 : vector<8x32xf32>
    %546 = arith.mulf %540, %545 : vector<8x32xf32>
    %c0_384 = arith.constant 0 : index
    %c0_385 = arith.constant 0 : index
    %547 = vector.load %arg7[%c0_384, %c0_385] : memref<8x32xf32, #tpu.memory_space<vmem>>, vector<8x32xf32>
    tpu.vector_store %arg7[%c0_384, %c0_385], %546 {strides = array<i32>} : memref<8x32xf32, #tpu.memory_space<vmem>>, vector<8x32xf32>,
    %c0_386 = arith.constant 0 : index
    %c0_387 = arith.constant 0 : index
    %548 = vector.load %arg8[%c0_386, %c0_387] : memref<8x32xf32, #tpu.memory_space<vmem>>, vector<8x32xf32>
    tpu.vector_store %arg8[%c0_386, %c0_387], %544 {strides = array<i32>} : memref<8x32xf32, #tpu.memory_space<vmem>>, vector<8x32xf32>,
    %c1_i32_388 = arith.constant 1 : i32
    %549 = arith.index_cast %c1_i32_388 : i32 to index
    %c0_389 = arith.constant 0 : index
    %c0_390 = arith.constant 0 : index
    %550 = vector.load %arg9[%549, %c0_389, %c0_390] : memref<8x8x128xf32, #tpu.memory_space<vmem>>, vector<1x8x128xf32>
    %551 = vector.shape_cast %550 : vector<1x8x128xf32> to vector<8x128xf32>
    %c0_391 = arith.constant 0 : index
    %c0_392 = arith.constant 0 : index
    %552 = vector.load %arg7[%c0_391, %c0_392] : memref<8x32xf32, #tpu.memory_space<vmem>>, vector<8x32xf32>
    %c0_393 = arith.constant 0 : index
    %c0_394 = arith.constant 0 : index
    %553 = vector.load %arg3[%c0_393, %c0_394] : memref<32x128xf32, #tpu.memory_space<vmem>>, vector<32x128xf32>
    %cst_395 = arith.constant dense<0.000000e+00> : vector<8x128xf32>
    %554 = tpu.matmul %552, %553, %cst_395 {dimension_numbers = #tpu.dot_dimension_numbers<[1], [0], [0], [1], [0, 0, 1, 1], [], []>} : vector<8x32xf32>, vector<32x128xf32>, vector<8x128xf32> -> vector<8x128xf32>
    %555 = arith.addf %551, %554 : vector<8x128xf32>
    %556 = math.tanh %555 : vector<8x128xf32>
    %557 = arith.negf %555 : vector<8x128xf32>
    %558 = math.exp %557 : vector<8x128xf32>
    %cst_396 = arith.constant 1.000000e+00 : f32
    %559 = vector.broadcast %cst_396 : f32 to vector<8x128xf32>
    %560 = arith.addf %559, %558 : vector<8x128xf32>
    %561 = arith.divf %559, %560 : vector<8x128xf32>
    %562 = arith.select %522, %556, %561 : vector<8x128xi1>, vector<8x128xf32>
    %563 = vector.extract_strided_slice %562 {offsets = [0, 0], sizes = [8, 32], strides = [1, 1]} : vector<8x128xf32> to vector<8x32xf32>
    %564 = vector.extract_strided_slice %562 {offsets = [0, 32], sizes = [8, 32], strides = [1, 1]} : vector<8x128xf32> to vector<8x32xf32>
    %565 = vector.extract_strided_slice %562 {offsets = [0, 64], sizes = [8, 32], strides = [1, 1]} : vector<8x128xf32> to vector<8x32xf32>
    %566 = vector.extract_strided_slice %562 {offsets = [0, 96], sizes = [8, 32], strides = [1, 1]} : vector<8x128xf32> to vector<8x32xf32>
    %c0_397 = arith.constant 0 : index
    %c0_398 = arith.constant 0 : index
    %567 = vector.load %arg8[%c0_397, %c0_398] : memref<8x32xf32, #tpu.memory_space<vmem>>, vector<8x32xf32>
    %568 = arith.mulf %564, %567 : vector<8x32xf32>
    %569 = arith.mulf %563, %565 : vector<8x32xf32>
    %570 = arith.addf %568, %569 : vector<8x32xf32>
    %571 = math.tanh %570 : vector<8x32xf32>
    %572 = arith.mulf %566, %571 : vector<8x32xf32>
    %c0_399 = arith.constant 0 : index
    %c0_400 = arith.constant 0 : index
    %573 = vector.load %arg7[%c0_399, %c0_400] : memref<8x32xf32, #tpu.memory_space<vmem>>, vector<8x32xf32>
    tpu.vector_store %arg7[%c0_399, %c0_400], %572 {strides = array<i32>} : memref<8x32xf32, #tpu.memory_space<vmem>>, vector<8x32xf32>,
    %c0_401 = arith.constant 0 : index
    %c0_402 = arith.constant 0 : index
    %574 = vector.load %arg8[%c0_401, %c0_402] : memref<8x32xf32, #tpu.memory_space<vmem>>, vector<8x32xf32>
    tpu.vector_store %arg8[%c0_401, %c0_402], %570 {strides = array<i32>} : memref<8x32xf32, #tpu.memory_space<vmem>>, vector<8x32xf32>,
    %c2_i32_403 = arith.constant 2 : i32
    %575 = arith.index_cast %c2_i32_403 : i32 to index
    %c0_404 = arith.constant 0 : index
    %c0_405 = arith.constant 0 : index
    %576 = vector.load %arg9[%575, %c0_404, %c0_405] : memref<8x8x128xf32, #tpu.memory_space<vmem>>, vector<1x8x128xf32>
    %577 = vector.shape_cast %576 : vector<1x8x128xf32> to vector<8x128xf32>
    %c0_406 = arith.constant 0 : index
    %c0_407 = arith.constant 0 : index
    %578 = vector.load %arg7[%c0_406, %c0_407] : memref<8x32xf32, #tpu.memory_space<vmem>>, vector<8x32xf32>
    %c0_408 = arith.constant 0 : index
    %c0_409 = arith.constant 0 : index
    %579 = vector.load %arg3[%c0_408, %c0_409] : memref<32x128xf32, #tpu.memory_space<vmem>>, vector<32x128xf32>
    %cst_410 = arith.constant dense<0.000000e+00> : vector<8x128xf32>
    %580 = tpu.matmul %578, %579, %cst_410 {dimension_numbers = #tpu.dot_dimension_numbers<[1], [0], [0], [1], [0, 0, 1, 1], [], []>} : vector<8x32xf32>, vector<32x128xf32>, vector<8x128xf32> -> vector<8x128xf32>
    %581 = arith.addf %577, %580 : vector<8x128xf32>
    %582 = math.tanh %581 : vector<8x128xf32>
    %583 = arith.negf %581 : vector<8x128xf32>
    %584 = math.exp %583 : vector<8x128xf32>
    %cst_411 = arith.constant 1.000000e+00 : f32
    %585 = vector.broadcast %cst_411 : f32 to vector<8x128xf32>
    %586 = arith.addf %585, %584 : vector<8x128xf32>
    %587 = arith.divf %585, %586 : vector<8x128xf32>
    %588 = arith.select %522, %582, %587 : vector<8x128xi1>, vector<8x128xf32>
    %589 = vector.extract_strided_slice %588 {offsets = [0, 0], sizes = [8, 32], strides = [1, 1]} : vector<8x128xf32> to vector<8x32xf32>
    %590 = vector.extract_strided_slice %588 {offsets = [0, 32], sizes = [8, 32], strides = [1, 1]} : vector<8x128xf32> to vector<8x32xf32>
    %591 = vector.extract_strided_slice %588 {offsets = [0, 64], sizes = [8, 32], strides = [1, 1]} : vector<8x128xf32> to vector<8x32xf32>
    %592 = vector.extract_strided_slice %588 {offsets = [0, 96], sizes = [8, 32], strides = [1, 1]} : vector<8x128xf32> to vector<8x32xf32>
    %c0_412 = arith.constant 0 : index
    %c0_413 = arith.constant 0 : index
    %593 = vector.load %arg8[%c0_412, %c0_413] : memref<8x32xf32, #tpu.memory_space<vmem>>, vector<8x32xf32>
    %594 = arith.mulf %590, %593 : vector<8x32xf32>
    %595 = arith.mulf %589, %591 : vector<8x32xf32>
    %596 = arith.addf %594, %595 : vector<8x32xf32>
    %597 = math.tanh %596 : vector<8x32xf32>
    %598 = arith.mulf %592, %597 : vector<8x32xf32>
    %c0_414 = arith.constant 0 : index
    %c0_415 = arith.constant 0 : index
    %599 = vector.load %arg7[%c0_414, %c0_415] : memref<8x32xf32, #tpu.memory_space<vmem>>, vector<8x32xf32>
    tpu.vector_store %arg7[%c0_414, %c0_415], %598 {strides = array<i32>} : memref<8x32xf32, #tpu.memory_space<vmem>>, vector<8x32xf32>,
    %c0_416 = arith.constant 0 : index
    %c0_417 = arith.constant 0 : index
    %600 = vector.load %arg8[%c0_416, %c0_417] : memref<8x32xf32, #tpu.memory_space<vmem>>, vector<8x32xf32>
    tpu.vector_store %arg8[%c0_416, %c0_417], %596 {strides = array<i32>} : memref<8x32xf32, #tpu.memory_space<vmem>>, vector<8x32xf32>,
    %c3_i32_418 = arith.constant 3 : i32
    %601 = arith.index_cast %c3_i32_418 : i32 to index
    %c0_419 = arith.constant 0 : index
    %c0_420 = arith.constant 0 : index
    %602 = vector.load %arg9[%601, %c0_419, %c0_420] : memref<8x8x128xf32, #tpu.memory_space<vmem>>, vector<1x8x128xf32>
    %603 = vector.shape_cast %602 : vector<1x8x128xf32> to vector<8x128xf32>
    %c0_421 = arith.constant 0 : index
    %c0_422 = arith.constant 0 : index
    %604 = vector.load %arg7[%c0_421, %c0_422] : memref<8x32xf32, #tpu.memory_space<vmem>>, vector<8x32xf32>
    %c0_423 = arith.constant 0 : index
    %c0_424 = arith.constant 0 : index
    %605 = vector.load %arg3[%c0_423, %c0_424] : memref<32x128xf32, #tpu.memory_space<vmem>>, vector<32x128xf32>
    %cst_425 = arith.constant dense<0.000000e+00> : vector<8x128xf32>
    %606 = tpu.matmul %604, %605, %cst_425 {dimension_numbers = #tpu.dot_dimension_numbers<[1], [0], [0], [1], [0, 0, 1, 1], [], []>} : vector<8x32xf32>, vector<32x128xf32>, vector<8x128xf32> -> vector<8x128xf32>
    %607 = arith.addf %603, %606 : vector<8x128xf32>
    %608 = math.tanh %607 : vector<8x128xf32>
    %609 = arith.negf %607 : vector<8x128xf32>
    %610 = math.exp %609 : vector<8x128xf32>
    %cst_426 = arith.constant 1.000000e+00 : f32
    %611 = vector.broadcast %cst_426 : f32 to vector<8x128xf32>
    %612 = arith.addf %611, %610 : vector<8x128xf32>
    %613 = arith.divf %611, %612 : vector<8x128xf32>
    %614 = arith.select %522, %608, %613 : vector<8x128xi1>, vector<8x128xf32>
    %615 = vector.extract_strided_slice %614 {offsets = [0, 0], sizes = [8, 32], strides = [1, 1]} : vector<8x128xf32> to vector<8x32xf32>
    %616 = vector.extract_strided_slice %614 {offsets = [0, 32], sizes = [8, 32], strides = [1, 1]} : vector<8x128xf32> to vector<8x32xf32>
    %617 = vector.extract_strided_slice %614 {offsets = [0, 64], sizes = [8, 32], strides = [1, 1]} : vector<8x128xf32> to vector<8x32xf32>
    %618 = vector.extract_strided_slice %614 {offsets = [0, 96], sizes = [8, 32], strides = [1, 1]} : vector<8x128xf32> to vector<8x32xf32>
    %c0_427 = arith.constant 0 : index
    %c0_428 = arith.constant 0 : index
    %619 = vector.load %arg8[%c0_427, %c0_428] : memref<8x32xf32, #tpu.memory_space<vmem>>, vector<8x32xf32>
    %620 = arith.mulf %616, %619 : vector<8x32xf32>
    %621 = arith.mulf %615, %617 : vector<8x32xf32>
    %622 = arith.addf %620, %621 : vector<8x32xf32>
    %623 = math.tanh %622 : vector<8x32xf32>
    %624 = arith.mulf %618, %623 : vector<8x32xf32>
    %c0_429 = arith.constant 0 : index
    %c0_430 = arith.constant 0 : index
    %625 = vector.load %arg7[%c0_429, %c0_430] : memref<8x32xf32, #tpu.memory_space<vmem>>, vector<8x32xf32>
    tpu.vector_store %arg7[%c0_429, %c0_430], %624 {strides = array<i32>} : memref<8x32xf32, #tpu.memory_space<vmem>>, vector<8x32xf32>,
    %c0_431 = arith.constant 0 : index
    %c0_432 = arith.constant 0 : index
    %626 = vector.load %arg8[%c0_431, %c0_432] : memref<8x32xf32, #tpu.memory_space<vmem>>, vector<8x32xf32>
    tpu.vector_store %arg8[%c0_431, %c0_432], %622 {strides = array<i32>} : memref<8x32xf32, #tpu.memory_space<vmem>>, vector<8x32xf32>,
    %c4_i32_433 = arith.constant 4 : i32
    %627 = arith.index_cast %c4_i32_433 : i32 to index
    %c0_434 = arith.constant 0 : index
    %c0_435 = arith.constant 0 : index
    %628 = vector.load %arg9[%627, %c0_434, %c0_435] : memref<8x8x128xf32, #tpu.memory_space<vmem>>, vector<1x8x128xf32>
    %629 = vector.shape_cast %628 : vector<1x8x128xf32> to vector<8x128xf32>
    %c0_436 = arith.constant 0 : index
    %c0_437 = arith.constant 0 : index
    %630 = vector.load %arg7[%c0_436, %c0_437] : memref<8x32xf32, #tpu.memory_space<vmem>>, vector<8x32xf32>
    %c0_438 = arith.constant 0 : index
    %c0_439 = arith.constant 0 : index
    %631 = vector.load %arg3[%c0_438, %c0_439] : memref<32x128xf32, #tpu.memory_space<vmem>>, vector<32x128xf32>
    %cst_440 = arith.constant dense<0.000000e+00> : vector<8x128xf32>
    %632 = tpu.matmul %630, %631, %cst_440 {dimension_numbers = #tpu.dot_dimension_numbers<[1], [0], [0], [1], [0, 0, 1, 1], [], []>} : vector<8x32xf32>, vector<32x128xf32>, vector<8x128xf32> -> vector<8x128xf32>
    %633 = arith.addf %629, %632 : vector<8x128xf32>
    %634 = math.tanh %633 : vector<8x128xf32>
    %635 = arith.negf %633 : vector<8x128xf32>
    %636 = math.exp %635 : vector<8x128xf32>
    %cst_441 = arith.constant 1.000000e+00 : f32
    %637 = vector.broadcast %cst_441 : f32 to vector<8x128xf32>
    %638 = arith.addf %637, %636 : vector<8x128xf32>
    %639 = arith.divf %637, %638 : vector<8x128xf32>
    %640 = arith.select %522, %634, %639 : vector<8x128xi1>, vector<8x128xf32>
    %641 = vector.extract_strided_slice %640 {offsets = [0, 0], sizes = [8, 32], strides = [1, 1]} : vector<8x128xf32> to vector<8x32xf32>
    %642 = vector.extract_strided_slice %640 {offsets = [0, 32], sizes = [8, 32], strides = [1, 1]} : vector<8x128xf32> to vector<8x32xf32>
    %643 = vector.extract_strided_slice %640 {offsets = [0, 64], sizes = [8, 32], strides = [1, 1]} : vector<8x128xf32> to vector<8x32xf32>
    %644 = vector.extract_strided_slice %640 {offsets = [0, 96], sizes = [8, 32], strides = [1, 1]} : vector<8x128xf32> to vector<8x32xf32>
    %c0_442 = arith.constant 0 : index
    %c0_443 = arith.constant 0 : index
    %645 = vector.load %arg8[%c0_442, %c0_443] : memref<8x32xf32, #tpu.memory_space<vmem>>, vector<8x32xf32>
    %646 = arith.mulf %642, %645 : vector<8x32xf32>
    %647 = arith.mulf %641, %643 : vector<8x32xf32>
    %648 = arith.addf %646, %647 : vector<8x32xf32>
    %649 = math.tanh %648 : vector<8x32xf32>
    %650 = arith.mulf %644, %649 : vector<8x32xf32>
    %c0_444 = arith.constant 0 : index
    %c0_445 = arith.constant 0 : index
    %651 = vector.load %arg7[%c0_444, %c0_445] : memref<8x32xf32, #tpu.memory_space<vmem>>, vector<8x32xf32>
    tpu.vector_store %arg7[%c0_444, %c0_445], %650 {strides = array<i32>} : memref<8x32xf32, #tpu.memory_space<vmem>>, vector<8x32xf32>,
    %c0_446 = arith.constant 0 : index
    %c0_447 = arith.constant 0 : index
    %652 = vector.load %arg8[%c0_446, %c0_447] : memref<8x32xf32, #tpu.memory_space<vmem>>, vector<8x32xf32>
    tpu.vector_store %arg8[%c0_446, %c0_447], %648 {strides = array<i32>} : memref<8x32xf32, #tpu.memory_space<vmem>>, vector<8x32xf32>,
    %c5_i32_448 = arith.constant 5 : i32
    %653 = arith.index_cast %c5_i32_448 : i32 to index
    %c0_449 = arith.constant 0 : index
    %c0_450 = arith.constant 0 : index
    %654 = vector.load %arg9[%653, %c0_449, %c0_450] : memref<8x8x128xf32, #tpu.memory_space<vmem>>, vector<1x8x128xf32>
    %655 = vector.shape_cast %654 : vector<1x8x128xf32> to vector<8x128xf32>
    %c0_451 = arith.constant 0 : index
    %c0_452 = arith.constant 0 : index
    %656 = vector.load %arg7[%c0_451, %c0_452] : memref<8x32xf32, #tpu.memory_space<vmem>>, vector<8x32xf32>
    %c0_453 = arith.constant 0 : index
    %c0_454 = arith.constant 0 : index
    %657 = vector.load %arg3[%c0_453, %c0_454] : memref<32x128xf32, #tpu.memory_space<vmem>>, vector<32x128xf32>
    %cst_455 = arith.constant dense<0.000000e+00> : vector<8x128xf32>
    %658 = tpu.matmul %656, %657, %cst_455 {dimension_numbers = #tpu.dot_dimension_numbers<[1], [0], [0], [1], [0, 0, 1, 1], [], []>} : vector<8x32xf32>, vector<32x128xf32>, vector<8x128xf32> -> vector<8x128xf32>
    %659 = arith.addf %655, %658 : vector<8x128xf32>
    %660 = math.tanh %659 : vector<8x128xf32>
    %661 = arith.negf %659 : vector<8x128xf32>
    %662 = math.exp %661 : vector<8x128xf32>
    %cst_456 = arith.constant 1.000000e+00 : f32
    %663 = vector.broadcast %cst_456 : f32 to vector<8x128xf32>
    %664 = arith.addf %663, %662 : vector<8x128xf32>
    %665 = arith.divf %663, %664 : vector<8x128xf32>
    %666 = arith.select %522, %660, %665 : vector<8x128xi1>, vector<8x128xf32>
    %667 = vector.extract_strided_slice %666 {offsets = [0, 0], sizes = [8, 32], strides = [1, 1]} : vector<8x128xf32> to vector<8x32xf32>
    %668 = vector.extract_strided_slice %666 {offsets = [0, 32], sizes = [8, 32], strides = [1, 1]} : vector<8x128xf32> to vector<8x32xf32>
    %669 = vector.extract_strided_slice %666 {offsets = [0, 64], sizes = [8, 32], strides = [1, 1]} : vector<8x128xf32> to vector<8x32xf32>
    %670 = vector.extract_strided_slice %666 {offsets = [0, 96], sizes = [8, 32], strides = [1, 1]} : vector<8x128xf32> to vector<8x32xf32>
    %c0_457 = arith.constant 0 : index
    %c0_458 = arith.constant 0 : index
    %671 = vector.load %arg8[%c0_457, %c0_458] : memref<8x32xf32, #tpu.memory_space<vmem>>, vector<8x32xf32>
    %672 = arith.mulf %668, %671 : vector<8x32xf32>
    %673 = arith.mulf %667, %669 : vector<8x32xf32>
    %674 = arith.addf %672, %673 : vector<8x32xf32>
    %675 = math.tanh %674 : vector<8x32xf32>
    %676 = arith.mulf %670, %675 : vector<8x32xf32>
    %c0_459 = arith.constant 0 : index
    %c0_460 = arith.constant 0 : index
    %677 = vector.load %arg7[%c0_459, %c0_460] : memref<8x32xf32, #tpu.memory_space<vmem>>, vector<8x32xf32>
    tpu.vector_store %arg7[%c0_459, %c0_460], %676 {strides = array<i32>} : memref<8x32xf32, #tpu.memory_space<vmem>>, vector<8x32xf32>,
    %c0_461 = arith.constant 0 : index
    %c0_462 = arith.constant 0 : index
    %678 = vector.load %arg8[%c0_461, %c0_462] : memref<8x32xf32, #tpu.memory_space<vmem>>, vector<8x32xf32>
    tpu.vector_store %arg8[%c0_461, %c0_462], %674 {strides = array<i32>} : memref<8x32xf32, #tpu.memory_space<vmem>>, vector<8x32xf32>,
    %c6_i32_463 = arith.constant 6 : i32
    %679 = arith.index_cast %c6_i32_463 : i32 to index
    %c0_464 = arith.constant 0 : index
    %c0_465 = arith.constant 0 : index
    %680 = vector.load %arg9[%679, %c0_464, %c0_465] : memref<8x8x128xf32, #tpu.memory_space<vmem>>, vector<1x8x128xf32>
    %681 = vector.shape_cast %680 : vector<1x8x128xf32> to vector<8x128xf32>
    %c0_466 = arith.constant 0 : index
    %c0_467 = arith.constant 0 : index
    %682 = vector.load %arg7[%c0_466, %c0_467] : memref<8x32xf32, #tpu.memory_space<vmem>>, vector<8x32xf32>
    %c0_468 = arith.constant 0 : index
    %c0_469 = arith.constant 0 : index
    %683 = vector.load %arg3[%c0_468, %c0_469] : memref<32x128xf32, #tpu.memory_space<vmem>>, vector<32x128xf32>
    %cst_470 = arith.constant dense<0.000000e+00> : vector<8x128xf32>
    %684 = tpu.matmul %682, %683, %cst_470 {dimension_numbers = #tpu.dot_dimension_numbers<[1], [0], [0], [1], [0, 0, 1, 1], [], []>} : vector<8x32xf32>, vector<32x128xf32>, vector<8x128xf32> -> vector<8x128xf32>
    %685 = arith.addf %681, %684 : vector<8x128xf32>
    %686 = math.tanh %685 : vector<8x128xf32>
    %687 = arith.negf %685 : vector<8x128xf32>
    %688 = math.exp %687 : vector<8x128xf32>
    %cst_471 = arith.constant 1.000000e+00 : f32
    %689 = vector.broadcast %cst_471 : f32 to vector<8x128xf32>
    %690 = arith.addf %689, %688 : vector<8x128xf32>
    %691 = arith.divf %689, %690 : vector<8x128xf32>
    %692 = arith.select %522, %686, %691 : vector<8x128xi1>, vector<8x128xf32>
    %693 = vector.extract_strided_slice %692 {offsets = [0, 0], sizes = [8, 32], strides = [1, 1]} : vector<8x128xf32> to vector<8x32xf32>
    %694 = vector.extract_strided_slice %692 {offsets = [0, 32], sizes = [8, 32], strides = [1, 1]} : vector<8x128xf32> to vector<8x32xf32>
    %695 = vector.extract_strided_slice %692 {offsets = [0, 64], sizes = [8, 32], strides = [1, 1]} : vector<8x128xf32> to vector<8x32xf32>
    %696 = vector.extract_strided_slice %692 {offsets = [0, 96], sizes = [8, 32], strides = [1, 1]} : vector<8x128xf32> to vector<8x32xf32>
    %c0_472 = arith.constant 0 : index
    %c0_473 = arith.constant 0 : index
    %697 = vector.load %arg8[%c0_472, %c0_473] : memref<8x32xf32, #tpu.memory_space<vmem>>, vector<8x32xf32>
    %698 = arith.mulf %694, %697 : vector<8x32xf32>
    %699 = arith.mulf %693, %695 : vector<8x32xf32>
    %700 = arith.addf %698, %699 : vector<8x32xf32>
    %701 = math.tanh %700 : vector<8x32xf32>
    %702 = arith.mulf %696, %701 : vector<8x32xf32>
    %c0_474 = arith.constant 0 : index
    %c0_475 = arith.constant 0 : index
    %703 = vector.load %arg7[%c0_474, %c0_475] : memref<8x32xf32, #tpu.memory_space<vmem>>, vector<8x32xf32>
    tpu.vector_store %arg7[%c0_474, %c0_475], %702 {strides = array<i32>} : memref<8x32xf32, #tpu.memory_space<vmem>>, vector<8x32xf32>,
    %c0_476 = arith.constant 0 : index
    %c0_477 = arith.constant 0 : index
    %704 = vector.load %arg8[%c0_476, %c0_477] : memref<8x32xf32, #tpu.memory_space<vmem>>, vector<8x32xf32>
    tpu.vector_store %arg8[%c0_476, %c0_477], %700 {strides = array<i32>} : memref<8x32xf32, #tpu.memory_space<vmem>>, vector<8x32xf32>,
    %c7_i32_478 = arith.constant 7 : i32
    %705 = arith.index_cast %c7_i32_478 : i32 to index
    %c0_479 = arith.constant 0 : index
    %c0_480 = arith.constant 0 : index
    %706 = vector.load %arg9[%705, %c0_479, %c0_480] : memref<8x8x128xf32, #tpu.memory_space<vmem>>, vector<1x8x128xf32>
    %707 = vector.shape_cast %706 : vector<1x8x128xf32> to vector<8x128xf32>
    %c0_481 = arith.constant 0 : index
    %c0_482 = arith.constant 0 : index
    %708 = vector.load %arg7[%c0_481, %c0_482] : memref<8x32xf32, #tpu.memory_space<vmem>>, vector<8x32xf32>
    %c0_483 = arith.constant 0 : index
    %c0_484 = arith.constant 0 : index
    %709 = vector.load %arg3[%c0_483, %c0_484] : memref<32x128xf32, #tpu.memory_space<vmem>>, vector<32x128xf32>
    %cst_485 = arith.constant dense<0.000000e+00> : vector<8x128xf32>
    %710 = tpu.matmul %708, %709, %cst_485 {dimension_numbers = #tpu.dot_dimension_numbers<[1], [0], [0], [1], [0, 0, 1, 1], [], []>} : vector<8x32xf32>, vector<32x128xf32>, vector<8x128xf32> -> vector<8x128xf32>
    %711 = arith.addf %707, %710 : vector<8x128xf32>
    %712 = math.tanh %711 : vector<8x128xf32>
    %713 = arith.negf %711 : vector<8x128xf32>
    %714 = math.exp %713 : vector<8x128xf32>
    %cst_486 = arith.constant 1.000000e+00 : f32
    %715 = vector.broadcast %cst_486 : f32 to vector<8x128xf32>
    %716 = arith.addf %715, %714 : vector<8x128xf32>
    %717 = arith.divf %715, %716 : vector<8x128xf32>
    %718 = arith.select %522, %712, %717 : vector<8x128xi1>, vector<8x128xf32>
    %719 = vector.extract_strided_slice %718 {offsets = [0, 0], sizes = [8, 32], strides = [1, 1]} : vector<8x128xf32> to vector<8x32xf32>
    %720 = vector.extract_strided_slice %718 {offsets = [0, 32], sizes = [8, 32], strides = [1, 1]} : vector<8x128xf32> to vector<8x32xf32>
    %721 = vector.extract_strided_slice %718 {offsets = [0, 64], sizes = [8, 32], strides = [1, 1]} : vector<8x128xf32> to vector<8x32xf32>
    %722 = vector.extract_strided_slice %718 {offsets = [0, 96], sizes = [8, 32], strides = [1, 1]} : vector<8x128xf32> to vector<8x32xf32>
    %c0_487 = arith.constant 0 : index
    %c0_488 = arith.constant 0 : index
    %723 = vector.load %arg8[%c0_487, %c0_488] : memref<8x32xf32, #tpu.memory_space<vmem>>, vector<8x32xf32>
    %724 = arith.mulf %720, %723 : vector<8x32xf32>
    %725 = arith.mulf %719, %721 : vector<8x32xf32>
    %726 = arith.addf %724, %725 : vector<8x32xf32>
    %727 = math.tanh %726 : vector<8x32xf32>
    %728 = arith.mulf %722, %727 : vector<8x32xf32>
    %c0_489 = arith.constant 0 : index
    %c0_490 = arith.constant 0 : index
    %729 = vector.load %arg7[%c0_489, %c0_490] : memref<8x32xf32, #tpu.memory_space<vmem>>, vector<8x32xf32>
    tpu.vector_store %arg7[%c0_489, %c0_490], %728 {strides = array<i32>} : memref<8x32xf32, #tpu.memory_space<vmem>>, vector<8x32xf32>,
    %c0_491 = arith.constant 0 : index
    %c0_492 = arith.constant 0 : index
    %730 = vector.load %arg8[%c0_491, %c0_492] : memref<8x32xf32, #tpu.memory_space<vmem>>, vector<8x32xf32>
    tpu.vector_store %arg8[%c0_491, %c0_492], %726 {strides = array<i32>} : memref<8x32xf32, #tpu.memory_space<vmem>>, vector<8x32xf32>,
    %c8_i32_493 = arith.constant 8 : i32
    %c0_494 = arith.constant 0 : index
    %c0_495 = arith.constant 0 : index
    %731 = vector.load %arg7[%c0_494, %c0_495] : memref<8x32xf32, #tpu.memory_space<vmem>>, vector<8x32xf32>
    %c0_496 = arith.constant 0 : index
    %c0_497 = arith.constant 0 : index
    %732 = vector.load %arg4[%c0_496, %c0_497] : memref<32x8xf32, #tpu.memory_space<vmem>>, vector<32x8xf32>
    %cst_498 = arith.constant dense<0.000000e+00> : vector<8x8xf32>
    %733 = tpu.matmul %731, %732, %cst_498 {dimension_numbers = #tpu.dot_dimension_numbers<[1], [0], [0], [1], [0, 0, 1, 1], [], []>} : vector<8x32xf32>, vector<32x8xf32>, vector<8x8xf32> -> vector<8x8xf32>
    %c0_499 = arith.constant 0 : index
    %c0_500 = arith.constant 0 : index
    %734 = vector.load %arg5[%c0_499, %c0_500] : memref<1x8xf32, #tpu.memory_space<vmem>>, vector<1x8xf32>
    %735 = vector.broadcast %734 : vector<1x8xf32> to vector<8x8xf32>
    %736 = arith.addf %733, %735 : vector<8x8xf32>
    %cst_501 = arith.constant dense<0xFF800000> : vector<8xf32>
    %737 = vector.multi_reduction <maximumf>, %736, %cst_501 [1] : vector<8x8xf32> to vector<8xf32>
    %738 = vector.shape_cast %737 : vector<8xf32> to vector<8x1xf32>
    %739 = vector.broadcast %738 : vector<8x1xf32> to vector<8x8xf32>
    %740 = arith.subf %736, %739 : vector<8x8xf32>
    %741 = math.exp %740 : vector<8x8xf32>
    %cst_502 = arith.constant dense<0.000000e+00> : vector<8xf32>
    %742 = vector.multi_reduction <add>, %741, %cst_502 [1] : vector<8x8xf32> to vector<8xf32>
    %743 = vector.shape_cast %742 : vector<8xf32> to vector<8x1xf32>
    %744 = vector.broadcast %743 : vector<8x1xf32> to vector<8x8xf32>
    %745 = arith.divf %741, %744 : vector<8x8xf32>
    %c0_503 = arith.constant 0 : index
    %c0_504 = arith.constant 0 : index
    %746 = vector.load %arg6[%c0_503, %c0_504] : memref<8x8xf32, #tpu.memory_space<vmem>>, vector<8x8xf32>
    tpu.vector_store %arg6[%c0_503, %c0_504], %745 {strides = array<i32>} : memref<8x8xf32, #tpu.memory_space<vmem>>, vector<8x8xf32>,
    return
  }
  func.func @transform_0(%arg0: i32, %arg1: memref<8x8xi32, #tpu.memory_space<smem>>) -> (i32, i32) {
    %c0_i32 = arith.constant 0 : i32
    %c0_i32_0 = arith.constant 0 : i32
    %c0_i32_1 = arith.constant 0 : i32
    return %c0_i32, %c0_i32_0 : i32, i32
  }
  func.func @transform_1(%arg0: i32, %arg1: memref<8x8xi32, #tpu.memory_space<smem>>) -> (i32, i32) {
    %c0_i32 = arith.constant 0 : i32
    %c0_i32_0 = arith.constant 0 : i32
    %c0_i32_1 = arith.constant 0 : i32
    return %c0_i32, %c0_i32_0 : i32, i32
  }
  func.func @transform_2(%arg0: i32, %arg1: memref<8x8xi32, #tpu.memory_space<smem>>) -> (i32, i32) {
    %c0_i32 = arith.constant 0 : i32
    %c0_i32_0 = arith.constant 0 : i32
    %c0_i32_1 = arith.constant 0 : i32
    return %c0_i32, %c0_i32_0 : i32, i32
  }
  func.func @transform_3(%arg0: i32, %arg1: memref<8x8xi32, #tpu.memory_space<smem>>) -> (i32, i32) {
    %c0_i32 = arith.constant 0 : i32
    %c0_i32_0 = arith.constant 0 : i32
    %c0_i32_1 = arith.constant 0 : i32
    return %c0_i32, %c0_i32_0 : i32, i32
  }
  func.func @transform_4(%arg0: i32, %arg1: memref<8x8xi32, #tpu.memory_space<smem>>) -> (i32, i32) {
    %c0_i32 = arith.constant 0 : i32
    %c0_i32_0 = arith.constant 0 : i32
    return %arg0, %c0_i32 : i32, i32
  }
}

</mosaic_0001>

<bundles_post_ra>
// kernel: tpu_custom_call.1
= control target key start
LH: loop header
LB: loop body
LE: loop exit
PB: predicated region body
PF: predicated region fallthrough
CT: control target
= control target key end

     0   :  { %s2206_s0 = inlined_call_operand.vmem [shape: s32[8,8], index: 0, kind: input, shape index: {}]   ;;  %s2207_s1 = inlined_call_operand.hbm [shape: f32[100,128], index: 1, kind: input, shape index: {}]   ;;  %s2208_s2 = inlined_call_operand.vmem [shape: f32[32,128], index: 2, kind: input, shape index: {}]   ;;  %s2209_s3 = inlined_call_operand.vmem [shape: f32[32,8], index: 3, kind: input, shape index: {}]   ;;  %s2210_s4 = inlined_call_operand.vmem [shape: f32[1,8], index: 4, kind: input, shape index: {}]   ;;  %s2211_s5 = inlined_call_operand.hbm [shape: f32[8,8], index: 5, kind: output, shape index: {}]  }
   0x1   :  { %s10_s20 = sshll.u32 %s2206_s0, 4  ;;  %s11_s20 = int_to_ptr.vmem [resolvable:$true] %s10_s20 }
   0x2   :  { %s1877_s21 = scalar_lea.vmem %s11_s20, 128  ;;  %p1882_p1 = scmp.lt.s32.totalorder %s11_s20, %s11_s20 }
   0x3   :  { %p1878_p0 = scmp.ne.s32.totalorder %s11_s20, %s1877_s21  ;;  %p1883_p2 = scmp.lt.s32.totalorder %s1877_s21, %s1877_s21 }
   0x5   :  { %p1884_p3 = por %p1883_p2, %p1882_p1 }
   0x7   :  { %p1885_p4 = pnand %p1884_p3, %p1878_p0 }
   0x9   :  { %1888 = shalt.err (!%p1885_p4)  }
   0xa   :  { %s1939_s22 = smov [#allocation6]  }
   0xb   :  { %13 = dma.vmem_to_smem %s11_s20, 128, %s1939_s22, [#allocation5] }
   0xc   :  { %1933 = dma.done.wait [#allocation5], 128 }
   0xd   :  { %1934 = vsyncadd [#allocation5], 4294967168 }
   0xe   :  { %15 = sfence }
   0xf   :  { %16 = vsyncpa [#allocation8], 0 }
  0x10   :  { %17 = vsyncpa [#allocation9], 0  ;;  %s1940_s23 = smov [#allocation7]   ;;  %s1889_s26 = scalar_lea.hbm %s2207_s1, 1664 }
  0x11   :  { %s23_s24 = sshll.u32 %s1940_s23, 4  ;;  %p1890_p5 = scmp.ne.s32.totalorder %s2207_s1, %s1889_s26  ;;  %s24_s24 = int_to_ptr.vmem [resolvable:$true] %s23_s24 }
  0x12   :  { %p1893_p6 = scmp.lt.u32.totalorder %s1889_s26, %s2207_s1 }
  0x14   :  { %p1895_p7 = pnand %p1893_p6, %p1890_p5 }
  0x16   :  { %1898 = shalt.err (!%p1895_p7)
}
  0x17   :  { %s1899_s6 = scalar_lea.vmem %s24_s24, 1664  ;;  %p1904_p9 = scmp.lt.s32.totalorder %s24_s24, %s24_s24 }
  0x18   :  { %p1900_p8 = scmp.ne.s32.totalorder %s24_s24, %s1899_s6  ;;  %p1905_p10 = scmp.lt.s32.totalorder %s1899_s6, %s1899_s6 }
  0x1a   :  { %p1906_p11 = por %p1905_p10, %p1904_p9 }
  0x1c   :  { %p1907_p12 = pnand %p1906_p11, %p1900_p8 }
  0x1e   :  { %1910 = shalt.err (!%p1907_p12)
}
  0x1f   :  { %s1941_s7 = smov 128   ;;  %s1942_s8 = smov 8  }
  0x20   :  { %29 = dma.hbm_to_vmem [thread:$0]  %s2207_s1, 1664, %s24_s24, [#allocation8], %s1941_s7, %s1941_s7, %s1942_s8  }
  0x21   :  { %1935 = dma.done.wait [#allocation8], 1664  }
  0x22   :  { %1936 = vsyncadd [#allocation8], 4294965632  ;;  %vm374_vm0 = vcmask 261120   ;;  %v1943_v0 = vmov 0.0|0.0   ;;  %vm1944_vm1 = vmmov 0   ;;  %v1945_v1 = vmov 0.0  }
  0x23   :  { %1744 = vmatprep.subr.bf16.mxu0 %v1943_v0  ;;  %1653 = vmatprep.mubr.msk.f32.mxu0 %vm1944_vm1, %v1945_v1  ;;  %375 = vst.msk [vmem:[#allocation2] sm:$0xff] %vm374_vm0, %v1945_v1  ;;  %376 = vst.msk [vmem:[#allocation3] sm:$0xff] %vm374_vm0, %v1945_v1  ;;  %s41_s11 = sld [smem:[#allocation6]]  ;;  %v384_v2 = vld [vmem:[%s2208_s2] sm:$0xff]  ;;  %v385_v3 = vld [vmem:[%s2208_s2 + $0x8] sm:$0xff]  ;;  %v377_v23 = vlaneseq  ;;  %s1946_s8 = smov 64  }
  0x24   :  { %s1519_s12 = sld [smem:[#allocation6 + $0x80]]  ;;  %1750 = vmatprep.subr.bf16.mxu1 %v1943_v0  ;;  %1664 = vmatprep.mubr.msk.f32.mxu1 %vm1944_vm1, %v1945_v1  ;;  %v386_v4 = vld [vmem:[%s2208_s2 + $0x10] sm:$0xff]  ;;  %v2018_v5 = vpack.c.bf16 %v385_v3, %v384_v2  ;;  %v387_v6 = vld [vmem:[%s2208_s2 + $0x18] sm:$0xff]  ;;  %s1947_s9 = smov 32   ;;  %v1344_v26 = vld [vmem:[%s2209_s3 + $0x8] sm:$0xff]  ;;  %vm1427_vm5 = vcmask 64512  }
  0x25   :  { %s1520_s1 = sld [smem:[#allocation6 + $0x100]]  ;;  %v2024_v11 = vpack.c.bf16 %v387_v6, %v386_v4  ;;  %v378_v25 = vand.u32 127, %v377_v23  ;;  %s1948_s10 = smov 96  }
  0x26   :  { %s1521_s13 = sld [smem:[#allocation6 + $0x180]]  ;;  %1746 = vmatpush3.bf16.msra.mxu0 %v2018_v5  ;;  %1752 = vmatpush3.bf16.msra.mxu1 %v2018_v5 }
  0x27   :  { %s1522_s14 = sld [smem:[#allocation6 + $0x200]]  ;;  %1747 = vmatprep.subr.bf16.mxu0 %v1943_v0  ;;  %1753 = vmatprep.subr.bf16.mxu1 %v1943_v0  ;;  %vm379_vm2 = vcmp.ge.s32.totalorder %v378_v25, 64  ;;  %vm380_vm3 = vcmp.lt.s32.totalorder %v378_v25, 96 }
  0x28   :  { %s1523_s15 = sld [smem:[#allocation6 + $0x280]]  ;;  %vm2042_vm4 = vmand %vm379_vm2, %vm380_vm3 }
  0x29   :  { %s2005_s16 = sld [smem:[#allocation6 + $0x300]]  ;;  %s42_s0 = scalar_lea.vmem [#allocation7], %s41_s11 }
  0x2a   :  { %s2007_s17 = sld [smem:[#allocation6 + $0x380]]  ;;  %v43_v7 = vld [vmem:[%s42_s0] sm:$0x1]  ;;  %s48_s26 = scalar_lea.vmem [#allocation7], %s1519_s12  ;;  %1749 = vmatpush3.bf16.msra.mxu0 %v2024_v11  ;;  %1755 = vmatpush3.bf16.msra.mxu1 %v2024_v11  ;;  %v470_v30 = vld [vmem:[#allocation3] sm:$0xff] }
  0x2b   :  { %44 = vst [vmem:[#allocation4] sm:$0x1] %v43_v7  ;;  %v49_v8 = vld [vmem:[%s48_s26] sm:$0x1]  ;;  %s54_s27 = scalar_lea.vmem [#allocation7], %s1520_s1  ;;  %1756 = vmatprep.subr.bf16.mxu0 %v1943_v0  ;;  %1762 = vmatprep.subr.bf16.mxu1 %v1943_v0  ;;  %s1526_s11 = sld [smem:[#allocation6 + $0x1]] }
  0x2c   :  { %v55_v9 = vld [vmem:[%s54_s27] sm:$0x1]  ;;  %s60_s28 = scalar_lea.vmem [#allocation7], %s1521_s13  ;;  %50 = vst [vmem:[#allocation4 + $0x1] sm:$0x1] %v49_v8  ;;  %s1527_s12 = sld [smem:[#allocation6 + $0x81]] }
  0x2d   :  { %v61_v10 = vld [vmem:[%s60_s28] sm:$0x1]  ;;  %56 = vst [vmem:[#allocation4 + $0x2] sm:$0x1] %v55_v9  ;;  %s66_s29 = scalar_lea.vmem [#allocation7], %s1522_s14  ;;  %s1528_s1 = sld [smem:[#allocation6 + $0x101]] }
  0x2e   :  { %62 = vst [vmem:[#allocation4 + $0x3] sm:$0x1] %v61_v10  ;;  %v67_v12 = vld [vmem:[%s66_s29] sm:$0x1]  ;;  %s72_s30 = scalar_lea.vmem [#allocation7], %s1523_s15  ;;  %s1529_s13 = sld [smem:[#allocation6 + $0x181]] }
  0x2f   :  { %v73_v13 = vld [vmem:[%s72_s30] sm:$0x1]  ;;  %68 = vst [vmem:[#allocation4 + $0x4] sm:$0x1] %v67_v12  ;;  %s78_s6 = scalar_lea.vmem [#allocation7], %s2005_s16  ;;  %s1530_s14 = sld [smem:[#allocation6 + $0x201]] }
  0x30   :  { %74 = vst [vmem:[#allocation4 + $0x5] sm:$0x1] %v73_v13  ;;  %v79_v14 = vld [vmem:[%s78_s6] sm:$0x1]  ;;  %s84_s7 = scalar_lea.vmem [#allocation7], %s2007_s17  ;;  %s1531_s15 = sld [smem:[#allocation6 + $0x281]] }
  0x31   :  { %v85_v15 = vld [vmem:[%s84_s7] sm:$0x1]  ;;  %80 = vst [vmem:[#allocation4 + $0x6] sm:$0x1] %v79_v14  ;;  %s1532_s16 = sld [smem:[#allocation6 + $0x301]]  ;;  %s89_s18 = scalar_lea.vmem [#allocation7], %s1526_s11 }
  0x32   :  { %86 = vst [vmem:[#allocation4 + $0x7] sm:$0x1] %v85_v15  ;;  %v383_v16 = vld [vmem:[#allocation2] sm:$0xff]  ;;  %s1533_s17 = sld [smem:[#allocation6 + $0x381]]  ;;  %s95_s19 = scalar_lea.vmem [#allocation7], %s1527_s12 }
  0x33   :  { %1654 = vmatmul.mubr.msk.f32.vlgmr.msra.gmra.mrb[0].mxu0 %vm374_vm0, %v383_v16  ;;  %v90_v41 = vld [vmem:[%s89_s18] sm:$0x1]  ;;  %s100_s20 = scalar_lea.vmem [#allocation7], %s1528_s1  ;;  %s1534_s0 = sld [smem:[#allocation6 + $0x2]] }
  0x34   :  { %1758 = vmatpush3.bf16.msra.mxu0 %v2018_v5  ;;  %1675 = vmatprep.mubr.msk.f32.mxu0 %vm1944_vm1, %v1945_v1  ;;  %v96_v42 = vld [vmem:[%s95_s19] sm:$0x1]  ;;  %92 = vst [vmem:[#allocation4 + $0x8] sm:$0x1] %v90_v41  ;;  %s105_s21 = scalar_lea.vmem [#allocation7], %s1529_s13  ;;  %s1535_s26 = sld [smem:[#allocation6 + $0x82]] }
  0x35   :  { %1759 = vmatprep.subr.bf16.mxu0 %v1943_v0  ;;  %97 = vst [vmem:[#allocation4 + $0x9] sm:$0x1] %v96_v42  ;;  %v101_v43 = vld [vmem:[%s100_s20] sm:$0x1]  ;;  %s110_s22 = scalar_lea.vmem [#allocation7], %s1530_s14  ;;  %s1536_s27 = sld [smem:[#allocation6 + $0x102]] }
  0x36   :  { %v106_v44 = vld [vmem:[%s105_s21] sm:$0x1]  ;;  %102 = vst [vmem:[#allocation4 + $0xa] sm:$0x1] %v101_v43  ;;  %s115_s23 = scalar_lea.vmem [#allocation7], %s1531_s15  ;;  %s1537_s28 = sld [smem:[#allocation6 + $0x182]] }
  0x37   :  { %107 = vst [vmem:[#allocation4 + $0xb] sm:$0x1] %v106_v44  ;;  %v111_v45 = vld [vmem:[%s110_s22] sm:$0x1]  ;;  %s120_s24 = scalar_lea.vmem [#allocation7], %s1532_s16  ;;  %s1538_s29 = sld [smem:[#allocation6 + $0x202]] }
  0x38   :  { %1761 = vmatpush3.bf16.msra.mxu0 %v2024_v11  ;;  %v116_v46 = vld [vmem:[%s115_s23] sm:$0x1]  ;;  %112 = vst [vmem:[#allocation4 + $0xc] sm:$0x1] %v111_v45  ;;  %s125_s25 = scalar_lea.vmem [#allocation7], %s1533_s17  ;;  %s1539_s30 = sld [smem:[#allocation6 + $0x282]] }
  0x39   :  { %1768 = vmatprep.subr.bf16.mxu0 %v1943_v0  ;;  %v382_v17 = vld [vmem:[#allocation4] sm:$0xff]  ;;  %117 = vst [vmem:[#allocation4 + $0xd] sm:$0x1] %v116_v46  ;;  %v121_v47 = vld [vmem:[%s120_s24] sm:$0x1]  ;;  %s1540_s6 = sld [smem:[#allocation6 + $0x302]] }
  0x3a   :  { %v126_v48 = vld [vmem:[%s125_s25] sm:$0x1]  ;;  %122 = vst [vmem:[#allocation4 + $0xe] sm:$0x1] %v121_v47  ;;  %s1541_s7 = sld [smem:[#allocation6 + $0x382]]  ;;  %s130_s11 = scalar_lea.vmem [#allocation7], %s1534_s0 }
  0x3b   :  { %127 = vst [vmem:[#allocation4 + $0xf] sm:$0x1] %v126_v48  ;;  %v131_v12 = vld [vmem:[%s130_s11] sm:$0x1]  ;;  %s136_s12 = scalar_lea.vmem [#allocation7], %s1535_s26  ;;  %s141_s1 = scalar_lea.vmem [#allocation7], %s1536_s27 }
  0x3c   :  { %v137_v13 = vld [vmem:[%s136_s12] sm:$0x1]  ;;  %133 = vst [vmem:[#allocation4 + $0x10] sm:$0x1] %v131_v12  ;;  %s146_s13 = scalar_lea.vmem [#allocation7], %s1537_s28  ;;  %s1542_s18 = sld [smem:[#allocation6 + $0x3]] }
  0x3d   :  { %138 = vst [vmem:[#allocation4 + $0x11] sm:$0x1] %v137_v13  ;;  %v142_v14 = vld [vmem:[%s141_s1] sm:$0x1]  ;;  %s151_s14 = scalar_lea.vmem [#allocation7], %s1538_s29  ;;  %s1543_s19 = sld [smem:[#allocation6 + $0x83]] }
  0x3e   :  { %v147_v15 = vld [vmem:[%s146_s13] sm:$0x1]  ;;  %143 = vst [vmem:[#allocation4 + $0x12] sm:$0x1] %v142_v14  ;;  %s156_s15 = scalar_lea.vmem [#allocation7], %s1539_s30  ;;  %s1544_s20 = sld [smem:[#allocation6 + $0x103]] }
  0x3f   :  { %148 = vst [vmem:[#allocation4 + $0x13] sm:$0x1] %v147_v15  ;;  %v152_v16 = vld [vmem:[%s151_s14] sm:$0x1]  ;;  %s161_s16 = scalar_lea.vmem [#allocation7], %s1540_s6  ;;  %s1545_s21 = sld [smem:[#allocation6 + $0x183]] }
  0x40   :  { %153 = vst [vmem:[#allocation4 + $0x14] sm:$0x1] %v152_v16  ;;  %s166_s17 = scalar_lea.vmem [#allocation7], %s1541_s7  ;;  %s1546_s22 = sld [smem:[#allocation6 + $0x203]] }
  0x41   :  { %s1547_s23 = sld [smem:[#allocation6 + $0x283]]  ;;  %s1550_s11 = sld [smem:[#allocation6 + $0x4]] }
  0x42   :  { %v502_v52 = vld [vmem:[#allocation4 + $0x8] sm:$0xff]  ;;  %s1548_s24 = sld [smem:[#allocation6 + $0x303]]  ;;  %s171_s0 = scalar_lea.vmem [#allocation7], %s1542_s18 }
  0x43   :  { %s1549_s25 = sld [smem:[#allocation6 + $0x383]]  ;;  %v172_v44 = vld [vmem:[%s171_s0] sm:$0x1]  ;;  %s177_s26 = scalar_lea.vmem [#allocation7], %s1543_s19 }
  0x44   :  { %v178_v45 = vld [vmem:[%s177_s26] sm:$0x1]  ;;  %174 = vst [vmem:[#allocation4 + $0x18] sm:$0x1] %v172_v44  ;;  %s182_s27 = scalar_lea.vmem [#allocation7], %s1544_s20  ;;  %s1551_s12 = sld [smem:[#allocation6 + $0x84]] }
  0x45   :  { %179 = vst [vmem:[#allocation4 + $0x19] sm:$0x1] %v178_v45  ;;  %v183_v46 = vld [vmem:[%s182_s27] sm:$0x1]  ;;  %s187_s28 = scalar_lea.vmem [#allocation7], %s1545_s21  ;;  %s1552_s1 = sld [smem:[#allocation6 + $0x104]] }
  0x46   :  { %v188_v47 = vld [vmem:[%s187_s28] sm:$0x1]  ;;  %184 = vst [vmem:[#allocation4 + $0x1a] sm:$0x1] %v183_v46  ;;  %s192_s29 = scalar_lea.vmem [#allocation7], %s1546_s22  ;;  %s1553_s13 = sld [smem:[#allocation6 + $0x184]] }
  0x47   :  { %189 = vst [vmem:[#allocation4 + $0x1b] sm:$0x1] %v188_v47  ;;  %v193_v48 = vld [vmem:[%s192_s29] sm:$0x1]  ;;  %s197_s30 = scalar_lea.vmem [#allocation7], %s1547_s23  ;;  %s1554_s14 = sld [smem:[#allocation6 + $0x204]] }
  0x48   :  { %194 = vst [vmem:[#allocation4 + $0x1c] sm:$0x1] %v193_v48  ;;  %s202_s6 = scalar_lea.vmem [#allocation7], %s1548_s24  ;;  %s212_s18 = scalar_lea.vmem [#allocation7], %s1550_s11 }
  0x49   :  { %s207_s7 = scalar_lea.vmem [#allocation7], %s1549_s25  ;;  %v213_v15 = vld [vmem:[%s212_s18] sm:$0x1]  ;;  %s1558_s0 = sld [smem:[#allocation6 + $0x5]] }
  0x4a   :  { %s218_s19 = scalar_lea.vmem [#allocation7], %s1551_s12  ;;  %215 = vst [vmem:[#allocation4 + $0x20] sm:$0x1] %v213_v15  ;;  %s1559_s26 = sld [smem:[#allocation6 + $0x85]] }
  0x4b   :  { %v219_v16 = vld [vmem:[%s218_s19] sm:$0x1]  ;;  %s223_s20 = scalar_lea.vmem [#allocation7], %s1552_s1  ;;  %s1560_s27 = sld [smem:[#allocation6 + $0x105]] }
  0x4c   :  { %220 = vst [vmem:[#allocation4 + $0x21] sm:$0x1] %v219_v16  ;;  %s228_s21 = scalar_lea.vmem [#allocation7], %s1553_s13  ;;  %s1561_s28 = sld [smem:[#allocation6 + $0x185]] }
  0x4d   :  { %s233_s22 = scalar_lea.vmem [#allocation7], %s1554_s14  ;;  %s1562_s29 = sld [smem:[#allocation6 + $0x205]] }
  0x4e   :  { %s1566_s18 = sld [smem:[#allocation6 + $0x6]] }
  0x4f   :  { %s253_s11 = scalar_lea.vmem [#allocation7], %s1558_s0  ;;  %s1567_s19 = sld [smem:[#allocation6 + $0x86]] }
  0x50   :  { %v254_v45 = vld [vmem:[%s253_s11] sm:$0x1]  ;;  %s259_s12 = scalar_lea.vmem [#allocation7], %s1559_s26 }
  0x51   :  { %v260_v46 = vld [vmem:[%s259_s12] sm:$0x1]  ;;  %256 = vst [vmem:[#allocation4 + $0x28] sm:$0x1] %v254_v45  ;;  %s264_s1 = scalar_lea.vmem [#allocation7], %s1560_s27  ;;  %v1226_v45 = vld [vmem:[%s2208_s2 + $0x10] sm:$0xff] }
  0x52   :  { %261 = vst [vmem:[#allocation4 + $0x29] sm:$0x1] %v260_v46  ;;  %v265_v47 = vld [vmem:[%s264_s1] sm:$0x1]  ;;  %s269_s13 = scalar_lea.vmem [#allocation7], %s1561_s28  ;;  %v1227_v46 = vld [vmem:[%s2208_s2 + $0x18] sm:$0xff] }
  0x53   :  { %v270_v48 = vld [vmem:[%s269_s13] sm:$0x1]  ;;  %266 = vst [vmem:[#allocation4 + $0x2a] sm:$0x1] %v265_v47  ;;  %s274_s14 = scalar_lea.vmem [#allocation7], %s1562_s29  ;;  %v1790_v47 = vpack.c.bf16 %v1227_v46, %v1226_v45 }
  0x54   :  { %271 = vst [vmem:[#allocation4 + $0x2b] sm:$0x1] %v270_v48  ;;  %s294_s0 = scalar_lea.vmem [#allocation7], %s1566_s18  ;;  %s1574_s18 = sld [smem:[#allocation6 + $0x7]] }
  0x55   :  { %v295_v16 = vld [vmem:[%s294_s0] sm:$0x1]  ;;  %s300_s26 = scalar_lea.vmem [#allocation7], %s1567_s19  ;;  %s1575_s19 = sld [smem:[#allocation6 + $0x87]] }
  0x56   :  { %297 = vst [vmem:[#allocation4 + $0x30] sm:$0x1] %v295_v16 }
  0x5b   :  { %s341_s0 = scalar_lea.vmem [#allocation7], %s1575_s19 }
 0x106   :  { %v457_v18 = vpop.f32.mrb[0].mxu0 }
 0x107   :  { %v461_v19 = vadd.f32 %v457_v18, %v382_v17  ;;  %v1655_v20 = vpop.f32.mrb[1].mxu0  ;;  %v157_v17 = vld [vmem:[%s156_s15] sm:$0x1]  ;;  %s1555_s15 = sld [smem:[#allocation6 + $0x284]] }
 0x108   :  { %158 = vst [vmem:[#allocation4 + $0x15] sm:$0x1] %v157_v17  ;;  %v162_v18 = vld [vmem:[%s161_s16] sm:$0x1]  ;;  %s1556_s16 = sld [smem:[#allocation6 + $0x304]] }
 0x109   :  { %v1583_v21 = vmul.f32 -1.442695, %v461_v19  ;;  %163 = vst [vmem:[#allocation4 + $0x16] sm:$0x1] %v162_v18  ;;  %v224_v17 = vld [vmem:[%s223_s20] sm:$0x1] }
 0x10a   :  { %v229_v18 = vld [vmem:[%s228_s21] sm:$0x1]  ;;  %225 = vst [vmem:[#allocation4 + $0x22] sm:$0x1] %v224_v17  ;;  %s1568_s20 = sld [smem:[#allocation6 + $0x106]] }
 0x10b   :  { %1809 = vpow2.f32 %v1583_v21  ;;  %230 = vst [vmem:[#allocation4 + $0x23] sm:$0x1] %v229_v18  ;;  %s1569_s21 = sld [smem:[#allocation6 + $0x186]]  ;;  %v301_v17 = vld [vmem:[%s300_s26] sm:$0x1] }
 0x10c   :  { %1811 = vtanh.f32 %v461_v19  ;;  %v167_v19 = vld [vmem:[%s166_s17] sm:$0x1]  ;;  %s1557_s17 = sld [smem:[#allocation6 + $0x384]]  ;;  %302 = vst [vmem:[#allocation4 + $0x31] sm:$0x1] %v301_v17 }
 0x10d   :  { %168 = vst [vmem:[#allocation4 + $0x17] sm:$0x1] %v167_v19  ;;  %v234_v19 = vld [vmem:[%s233_s22] sm:$0x1]  ;;  %s238_s23 = scalar_lea.vmem [#allocation7], %s1555_s15  ;;  %s1570_s22 = sld [smem:[#allocation6 + $0x206]] }
 0x10e   :  { %235 = vst [vmem:[#allocation4 + $0x24] sm:$0x1] %v234_v19  ;;  %s243_s24 = scalar_lea.vmem [#allocation7], %s1556_s16 }
 0x110   :  { %s305_s27 = scalar_lea.vmem [#allocation7], %s1568_s20  ;;  %s1576_s20 = sld [smem:[#allocation6 + $0x107]] }
 0x111   :  { %v306_v18 = vld [vmem:[%s305_s27] sm:$0x1]  ;;  %s310_s28 = scalar_lea.vmem [#allocation7], %s1569_s21  ;;  %s1577_s21 = sld [smem:[#allocation6 + $0x187]] }
 0x112   :  { %s248_s25 = scalar_lea.vmem [#allocation7], %s1557_s17  ;;  %v311_v19 = vld [vmem:[%s310_s28] sm:$0x1]  ;;  %307 = vst [vmem:[#allocation4 + $0x32] sm:$0x1] %v306_v18 }
 0x113   :  { %312 = vst [vmem:[#allocation4 + $0x33] sm:$0x1] %v311_v19  ;;  %s315_s29 = scalar_lea.vmem [#allocation7], %s1570_s22  ;;  %s1578_s22 = sld [smem:[#allocation6 + $0x207]]  ;;  %v1343_v19 = vld [vmem:[%s2209_s3] sm:$0xff] }
 0x114   :  { %v622_v23 = vld [vmem:[#allocation4 + $0x10] sm:$0xff] }
 0x115   :  { %v1810_v22 = vpop.eup %1809 }
 0x116   :  { %v466_v24 = vadd.f32 1.0, %v1810_v22  ;;  %v1812_v27 = vpop.eup %1811  ;;  %s346_s26 = scalar_lea.vmem [#allocation7], %s1576_s20 }
 0x117   :  { %s351_s27 = scalar_lea.vmem [#allocation7], %s1577_s21 }
 0x118   :  { %1813 = vrcp.f32 %v466_v24 }
 0x119   :  { %s356_s28 = scalar_lea.vmem [#allocation7], %s1578_s22 }
 0x122   :  { %v1814_v28 = vpop.eup %1813 }
 0x123   :  { %v469_v29 = vsel %vm2042_vm4, %v1812_v27, %v1814_v28 }
 0x124   :  { %477 = vrot.lane.b32.xlu0 %v469_v29, %s1946_s8 }
 0x128   :  { %472 = vrot.lane.b32.xlu0 %v470_v30, %s1947_s9 }
 0x196   :  { %v478_v31 = vpop.permute.xlu0 %477 }
 0x197   :  { %v480_v32 = vmul.f32 %v478_v31, %v469_v29 }
 0x199   :  { %482 = vrot.lane.b32.xlu1 %v480_v32, %s1947_s9 }
 0x19a   :  { %v473_v33 = vpop.permute.xlu0 %472 }
 0x19b   :  { %v475_v34 = vmul.f32 %v473_v33, %v469_v29 }
 0x20b   :  { %v483_v35 = vpop.permute.xlu1 %482 }
 0x20c   :  { %v485_v36 = vadd.f32 %v483_v35, %v475_v34 }
 0x20e   :  { %1815 = vtanh.f32 %v485_v36 }
 0x218   :  { %v1816_v37 = vpop.eup %1815 }
 0x219   :  { %488 = vrot.lane.b32.xlu1 %v1816_v37, %s1946_s8 }
 0x21d   :  { %498 = vrot.lane.b32.xlu1 %v485_v36, %s1948_s10 }
 0x28b   :  { %v489_v38 = vpop.permute.xlu1 %488 }
 0x28c   :  { %v491_v39 = vmul.f32 %v489_v38, %v469_v29 }
 0x28e   :  { %493 = vrot.lane.b32.xlu0 %v491_v39, %s1947_s9 }
 0x28f   :  { %v499_v40 = vpop.permute.xlu1 %498 }
 0x290   :  { %501 = vst.msk [vmem:[#allocation3] sm:$0xff] %vm374_vm0, %v499_v40 }
 0x297   :  { %v590_v49 = vld [vmem:[#allocation3] sm:$0xff] }
 0x298   :  { %592 = vrot.lane.b32.xlu1 %v590_v49, %s1947_s9  ;;  %v198_v49 = vld [vmem:[%s197_s30] sm:$0x1]  ;;  %s1563_s30 = sld [smem:[#allocation6 + $0x285]] }
 0x299   :  { %199 = vst [vmem:[#allocation4 + $0x1d] sm:$0x1] %v198_v49  ;;  %v275_v49 = vld [vmem:[%s274_s14] sm:$0x1] }
 0x29a   :  { %276 = vst [vmem:[#allocation4 + $0x2c] sm:$0x1] %v275_v49 }
 0x29e   :  { %s279_s15 = scalar_lea.vmem [#allocation7], %s1563_s30 }
 0x300   :  { %v494_v50 = vpop.permute.xlu0 %493 }
 0x301   :  { %496 = vst.msk [vmem:[#allocation2] sm:$0xff] %vm374_vm0, %v494_v50  ;;  %v203_v50 = vld [vmem:[%s202_s6] sm:$0x1]  ;;  %s1564_s6 = sld [smem:[#allocation6 + $0x305]] }
 0x302   :  { %204 = vst [vmem:[#allocation4 + $0x1e] sm:$0x1] %v203_v50  ;;  %v280_v50 = vld [vmem:[%s279_s15] sm:$0x1] }
 0x303   :  { %281 = vst [vmem:[#allocation4 + $0x2d] sm:$0x1] %v280_v50 }
 0x307   :  { %s284_s16 = scalar_lea.vmem [#allocation7], %s1564_s6 }
 0x308   :  { %v503_v51 = vld [vmem:[#allocation2] sm:$0xff] }
 0x309   :  { %1665 = vmatmul.mubr.msk.f32.vlgmr.msra.gmra.mrb[0].mxu1 %vm374_vm0, %v503_v51  ;;  %v208_v51 = vld [vmem:[%s207_s7] sm:$0x1]  ;;  %s1565_s7 = sld [smem:[#allocation6 + $0x385]] }
 0x30a   :  { %1764 = vmatpush3.bf16.msra.mxu1 %v2018_v5  ;;  %1686 = vmatprep.mubr.msk.f32.mxu1 %vm1944_vm1, %v1945_v1  ;;  %v593_v2 = vpop.permute.xlu1 %592  ;;  %209 = vst [vmem:[#allocation4 + $0x1f] sm:$0x1] %v208_v51  ;;  %v285_v51 = vld [vmem:[%s284_s16] sm:$0x1] }
 0x30b   :  { %1765 = vmatprep.subr.bf16.mxu1 %v1943_v0  ;;  %286 = vst [vmem:[#allocation4 + $0x2e] sm:$0x1] %v285_v51 }
 0x30e   :  { %1767 = vmatpush3.bf16.msra.mxu1 %v2024_v11 }
 0x30f   :  { %1774 = vmatprep.subr.bf16.mxu1 %v1943_v0  ;;  %s289_s17 = scalar_lea.vmem [#allocation7], %s1565_s7 }
 0x3dc   :  { %v577_v53 = vpop.f32.mrb[0].mxu1 }
 0x3dd   :  { %v581_v54 = vadd.f32 %v577_v53, %v502_v52  ;;  %v1666_v55 = vpop.f32.mrb[1].mxu1 }
 0x3de   :  { %v742_v55 = vld [vmem:[#allocation4 + $0x18] sm:$0xff] }
 0x3df   :  { %v1585_v56 = vmul.f32 -1.442695, %v581_v54 }
 0x3e1   :  { %1817 = vpow2.f32 %v1585_v56 }
 0x3e2   :  { %1819 = vtanh.f32 %v581_v54 }
 0x3eb   :  { %v1818_v57 = vpop.eup %1817 }
 0x3ec   :  { %v586_v58 = vadd.f32 1.0, %v1818_v57  ;;  %v1820_v59 = vpop.eup %1819 }
 0x3ee   :  { %1821 = vrcp.f32 %v586_v58 }
 0x3f8   :  { %v1822_v60 = vpop.eup %1821 }
 0x3f9   :  { %v589_v61 = vsel %vm2042_vm4, %v1820_v59, %v1822_v60 }
 0x3fa   :  { %597 = vrot.lane.b32.xlu0 %v589_v61, %s1946_s8  ;;  %v595_v3 = vmul.f32 %v593_v2, %v589_v61 }
 0x46c   :  { %v598_v62 = vpop.permute.xlu0 %597 }
 0x46d   :  { %v600_v63 = vmul.f32 %v598_v62, %v589_v61 }
 0x46f   :  { %602 = vrot.lane.b32.xlu0 %v600_v63, %s1947_s9 }
 0x4e1   :  { %v603_v4 = vpop.permute.xlu0 %602 }
 0x4e2   :  { %v605_v6 = vadd.f32 %v603_v4, %v595_v3 }
 0x4e4   :  { %1823 = vtanh.f32 %v605_v6 }
 0x4ee   :  { %v1824_v7 = vpop.eup %1823 }
 0x4ef   :  { %608 = vrot.lane.b32.xlu1 %v1824_v7, %s1946_s8 }
 0x4f3   :  { %618 = vrot.lane.b32.xlu1 %v605_v6, %s1948_s10 }
 0x561   :  { %v609_v8 = vpop.permute.xlu1 %608 }
 0x562   :  { %v611_v9 = vmul.f32 %v609_v8, %v589_v61 }
 0x564   :  { %613 = vrot.lane.b32.xlu0 %v611_v9, %s1947_s9 }
 0x565   :  { %v619_v10 = vpop.permute.xlu1 %618 }
 0x566   :  { %621 = vst.msk [vmem:[#allocation3] sm:$0xff] %vm374_vm0, %v619_v10 }
 0x56d   :  { %v710_v20 = vld [vmem:[#allocation3] sm:$0xff] }
 0x56e   :  { %712 = vrot.lane.b32.xlu1 %v710_v20, %s1947_s9  ;;  %v239_v20 = vld [vmem:[%s238_s23] sm:$0x1]  ;;  %s1571_s23 = sld [smem:[#allocation6 + $0x286]] }
 0x56f   :  { %240 = vst [vmem:[#allocation4 + $0x25] sm:$0x1] %v239_v20  ;;  %v316_v20 = vld [vmem:[%s315_s29] sm:$0x1] }
 0x570   :  { %317 = vst [vmem:[#allocation4 + $0x34] sm:$0x1] %v316_v20  ;;  %v1793_v20 = vpack.c.bf16 %v1344_v26, %v1343_v19 }
 0x574   :  { %s320_s30 = scalar_lea.vmem [#allocation7], %s1571_s23  ;;  %s1579_s23 = sld [smem:[#allocation6 + $0x287]] }
 0x57a   :  { %s361_s29 = scalar_lea.vmem [#allocation7], %s1579_s23 }
 0x5d6   :  { %v614_v21 = vpop.permute.xlu0 %613 }
 0x5d7   :  { %616 = vst.msk [vmem:[#allocation2] sm:$0xff] %vm374_vm0, %v614_v21  ;;  %v244_v21 = vld [vmem:[%s243_s24] sm:$0x1]  ;;  %s1572_s24 = sld [smem:[#allocation6 + $0x306]] }
 0x5d8   :  { %245 = vst [vmem:[#allocation4 + $0x26] sm:$0x1] %v244_v21  ;;  %v321_v21 = vld [vmem:[%s320_s30] sm:$0x1] }
 0x5d9   :  { %322 = vst [vmem:[#allocation4 + $0x35] sm:$0x1] %v321_v21  ;;  %v1345_v21 = vld [vmem:[%s2209_s3 + $0x10] sm:$0xff] }
 0x5dd   :  { %s325_s6 = scalar_lea.vmem [#allocation7], %s1572_s24  ;;  %s1580_s24 = sld [smem:[#allocation6 + $0x307]] }
 0x5de   :  { %v623_v22 = vld [vmem:[#allocation2] sm:$0xff] }
 0x5df   :  { %1676 = vmatmul.mubr.msk.f32.vlgmr.msra.gmra.mrb[2].mxu0 %vm374_vm0, %v623_v22  ;;  %v249_v22 = vld [vmem:[%s248_s25] sm:$0x1]  ;;  %s1573_s25 = sld [smem:[#allocation6 + $0x386]] }
 0x5e0   :  { %1770 = vmatpush3.bf16.msra.mxu0 %v2018_v5  ;;  %1697 = vmatprep.mubr.msk.f32.mxu0 %vm1944_vm1, %v1945_v1  ;;  %v713_v36 = vpop.permute.xlu1 %712  ;;  %250 = vst [vmem:[#allocation4 + $0x27] sm:$0x1] %v249_v22  ;;  %v326_v22 = vld [vmem:[%s325_s6] sm:$0x1] }
 0x5e1   :  { %1771 = vmatprep.subr.bf16.mxu0 %v1943_v0  ;;  %327 = vst [vmem:[#allocation4 + $0x36] sm:$0x1] %v326_v22  ;;  %v1346_v22 = vld [vmem:[%s2209_s3 + $0x18] sm:$0xff]  ;;  %s1949_s3 = smov [#allocation10]  }
 0x5e3   :  { %s366_s30 = scalar_lea.vmem [#allocation7], %s1580_s24 }
 0x5e4   :  { %1773 = vmatpush3.bf16.msra.mxu0 %v2024_v11 }
 0x5e5   :  { %1780 = vmatprep.subr.bf16.mxu0 %v1943_v0  ;;  %s330_s7 = scalar_lea.vmem [#allocation7], %s1573_s25  ;;  %s1581_s25 = sld [smem:[#allocation6 + $0x387]] }
 0x5eb   :  { %s371_s6 = scalar_lea.vmem [#allocation7], %s1581_s25 }
 0x6b2   :  { %v697_v24 = vpop.f32.mrb[2].mxu0 }
 0x6b3   :  { %v701_v25 = vadd.f32 %v697_v24, %v622_v23  ;;  %v1677_v27 = vpop.f32.mrb[3].mxu0 }
 0x6b4   :  { %v862_v27 = vld [vmem:[#allocation4 + $0x20] sm:$0xff] }
 0x6b5   :  { %v1587_v28 = vmul.f32 -1.442695, %v701_v25 }
 0x6b7   :  { %1825 = vpow2.f32 %v1587_v28 }
 0x6b8   :  { %1827 = vtanh.f32 %v701_v25 }
 0x6c1   :  { %v1826_v29 = vpop.eup %1825 }
 0x6c2   :  { %v706_v30 = vadd.f32 1.0, %v1826_v29  ;;  %v1828_v31 = vpop.eup %1827 }
 0x6c4   :  { %1829 = vrcp.f32 %v706_v30 }
 0x6ce   :  { %v1830_v32 = vpop.eup %1829 }
 0x6cf   :  { %v709_v33 = vsel %vm2042_vm4, %v1828_v31, %v1830_v32 }
 0x6d0   :  { %717 = vrot.lane.b32.xlu0 %v709_v33, %s1946_s8  ;;  %v715_v37 = vmul.f32 %v713_v36, %v709_v33 }
 0x742   :  { %v718_v34 = vpop.permute.xlu0 %717 }
 0x743   :  { %v720_v35 = vmul.f32 %v718_v34, %v709_v33 }
 0x745   :  { %722 = vrot.lane.b32.xlu0 %v720_v35, %s1947_s9 }
 0x7b7   :  { %v723_v38 = vpop.permute.xlu0 %722 }
 0x7b8   :  { %v725_v39 = vadd.f32 %v723_v38, %v715_v37 }
 0x7ba   :  { %1831 = vtanh.f32 %v725_v39 }
 0x7c4   :  { %v1832_v40 = vpop.eup %1831 }
 0x7c5   :  { %728 = vrot.lane.b32.xlu1 %v1832_v40, %s1946_s8 }
 0x7c9   :  { %738 = vrot.lane.b32.xlu1 %v725_v39, %s1948_s10 }
 0x837   :  { %v729_v41 = vpop.permute.xlu1 %728 }
 0x838   :  { %v731_v42 = vmul.f32 %v729_v41, %v709_v33 }
 0x83a   :  { %733 = vrot.lane.b32.xlu0 %v731_v42, %s1947_s9 }
 0x83b   :  { %v739_v43 = vpop.permute.xlu1 %738 }
 0x83c   :  { %741 = vst.msk [vmem:[#allocation3] sm:$0xff] %vm374_vm0, %v739_v43 }
 0x843   :  { %v830_v52 = vld [vmem:[#allocation3] sm:$0xff] }
 0x844   :  { %832 = vrot.lane.b32.xlu1 %v830_v52, %s1947_s9  ;;  %v290_v52 = vld [vmem:[%s289_s17] sm:$0x1] }
 0x845   :  { %291 = vst [vmem:[#allocation4 + $0x2f] sm:$0x1] %v290_v52  ;;  %v342_v52 = vld [vmem:[%s341_s0] sm:$0x1] }
 0x846   :  { %343 = vst [vmem:[#allocation4 + $0x39] sm:$0x1] %v342_v52 }
 0x8ac   :  { %v734_v53 = vpop.permute.xlu0 %733 }
 0x8ad   :  { %736 = vst.msk [vmem:[#allocation2] sm:$0xff] %vm374_vm0, %v734_v53 }
 0x8b4   :  { %v743_v54 = vld [vmem:[#allocation2] sm:$0xff] }
 0x8b5   :  { %1687 = vmatmul.mubr.msk.f32.vlgmr.msra.gmra.mrb[2].mxu1 %vm374_vm0, %v743_v54 }
 0x8b6   :  { %1776 = vmatpush3.bf16.msra.mxu1 %v2018_v5  ;;  %1708 = vmatprep.mubr.msk.f32.mxu1 %vm1944_vm1, %v1945_v1  ;;  %v833_v6 = vpop.permute.xlu1 %832 }
 0x8b7   :  { %1777 = vmatprep.subr.bf16.mxu1 %v1943_v0 }
 0x8ba   :  { %1779 = vmatpush3.bf16.msra.mxu1 %v2024_v11 }
 0x8bb   :  { %1786 = vmatprep.subr.bf16.mxu1 %v1943_v0 }
 0x988   :  { %v817_v56 = vpop.f32.mrb[2].mxu1 }
 0x989   :  { %v821_v57 = vadd.f32 %v817_v56, %v742_v55  ;;  %v1688_v58 = vpop.f32.mrb[3].mxu1  ;;  %v982_v56 = vld [vmem:[#allocation4 + $0x28] sm:$0xff] }
 0x98b   :  { %v1589_v59 = vmul.f32 -1.442695, %v821_v57 }
 0x98d   :  { %1833 = vpow2.f32 %v1589_v59 }
 0x98e   :  { %1835 = vtanh.f32 %v821_v57 }
 0x997   :  { %v1834_v60 = vpop.eup %1833 }
 0x998   :  { %v826_v61 = vadd.f32 1.0, %v1834_v60  ;;  %v1836_v62 = vpop.eup %1835 }
 0x99a   :  { %1837 = vrcp.f32 %v826_v61 }
 0x9a4   :  { %v1838_v63 = vpop.eup %1837 }
 0x9a5   :  { %v829_v2 = vsel %vm2042_vm4, %v1836_v62, %v1838_v63 }
 0x9a6   :  { %837 = vrot.lane.b32.xlu0 %v829_v2, %s1946_s8  ;;  %v835_v7 = vmul.f32 %v833_v6, %v829_v2 }
 0xa18   :  { %v838_v3 = vpop.permute.xlu0 %837 }
 0xa19   :  { %v840_v4 = vmul.f32 %v838_v3, %v829_v2 }
 0xa1b   :  { %842 = vrot.lane.b32.xlu0 %v840_v4, %s1947_s9 }
 0xa8d   :  { %v843_v8 = vpop.permute.xlu0 %842 }
 0xa8e   :  { %v845_v9 = vadd.f32 %v843_v8, %v835_v7 }
 0xa90   :  { %1839 = vtanh.f32 %v845_v9 }
 0xa9a   :  { %v1840_v10 = vpop.eup %1839 }
 0xa9b   :  { %848 = vrot.lane.b32.xlu1 %v1840_v10, %s1946_s8 }
 0xa9f   :  { %858 = vrot.lane.b32.xlu1 %v845_v9, %s1948_s10 }
 0xb0d   :  { %v849_v12 = vpop.permute.xlu1 %848 }
 0xb0e   :  { %v851_v13 = vmul.f32 %v849_v12, %v829_v2 }
 0xb10   :  { %853 = vrot.lane.b32.xlu0 %v851_v13, %s1947_s9 }
 0xb11   :  { %v859_v14 = vpop.permute.xlu1 %858 }
 0xb12   :  { %861 = vst.msk [vmem:[#allocation3] sm:$0xff] %vm374_vm0, %v859_v14 }
 0xb19   :  { %v950_v23 = vld [vmem:[#allocation3] sm:$0xff] }
 0xb1a   :  { %952 = vrot.lane.b32.xlu1 %v950_v23, %s1947_s9  ;;  %v331_v23 = vld [vmem:[%s330_s7] sm:$0x1] }
 0xb1b   :  { %332 = vst [vmem:[#allocation4 + $0x37] sm:$0x1] %v331_v23  ;;  %v1796_v23 = vpack.c.bf16 %v1346_v22, %v1345_v21 }
 0xb82   :  { %v854_v24 = vpop.permute.xlu0 %853 }
 0xb83   :  { %856 = vst.msk [vmem:[#allocation2] sm:$0xff] %vm374_vm0, %v854_v24 }
 0xb8a   :  { %v863_v25 = vld [vmem:[#allocation2] sm:$0xff] }
 0xb8b   :  { %1698 = vmatmul.mubr.msk.f32.vlgmr.msra.gmra.mrb[4].mxu0 %vm374_vm0, %v863_v25 }
 0xb8c   :  { %1782 = vmatpush3.bf16.msra.mxu0 %v2018_v5  ;;  %1719 = vmatprep.mubr.msk.f32.mxu0 %vm1944_vm1, %v1945_v1  ;;  %v953_v37 = vpop.permute.xlu1 %952 }
 0xb8d   :  { %1783 = vmatprep.subr.bf16.mxu0 %v1943_v0 }
 0xb90   :  { %1785 = vmatpush3.bf16.msra.mxu0 %v2024_v11 }
 0xb91   :  { %1792 = vmatprep.subr.bf16.mxu0 %v1943_v0 }
 0xc5e   :  { %v937_v28 = vpop.f32.mrb[4].mxu0 }
 0xc5f   :  { %v941_v29 = vadd.f32 %v937_v28, %v862_v27  ;;  %v1699_v30 = vpop.f32.mrb[5].mxu0  ;;  %v1102_v28 = vld [vmem:[#allocation4 + $0x30] sm:$0xff] }
 0xc61   :  { %v1591_v31 = vmul.f32 -1.442695, %v941_v29 }
 0xc63   :  { %1841 = vpow2.f32 %v1591_v31 }
 0xc64   :  { %1843 = vtanh.f32 %v941_v29 }
 0xc6d   :  { %v1842_v32 = vpop.eup %1841 }
 0xc6e   :  { %v946_v33 = vadd.f32 1.0, %v1842_v32  ;;  %v1844_v5 = vpop.eup %1843 }
 0xc70   :  { %1845 = vrcp.f32 %v946_v33 }
 0xc7a   :  { %v1846_v34 = vpop.eup %1845 }
 0xc7b   :  { %v949_v35 = vsel %vm2042_vm4, %v1844_v5, %v1846_v34 }
 0xc7c   :  { %957 = vrot.lane.b32.xlu0 %v949_v35, %s1946_s8  ;;  %v955_v38 = vmul.f32 %v953_v37, %v949_v35 }
 0xcee   :  { %v958_v11 = vpop.permute.xlu0 %957 }
 0xcef   :  { %v960_v36 = vmul.f32 %v958_v11, %v949_v35 }
 0xcf1   :  { %962 = vrot.lane.b32.xlu0 %v960_v36, %s1947_s9 }
 0xd63   :  { %v963_v39 = vpop.permute.xlu0 %962 }
 0xd64   :  { %v965_v40 = vadd.f32 %v963_v39, %v955_v38 }
 0xd66   :  { %1847 = vtanh.f32 %v965_v40 }
 0xd70   :  { %v1848_v41 = vpop.eup %1847 }
 0xd71   :  { %968 = vrot.lane.b32.xlu1 %v1848_v41, %s1946_s8 }
 0xd75   :  { %978 = vrot.lane.b32.xlu1 %v965_v40, %s1948_s10 }
 0xde3   :  { %v969_v42 = vpop.permute.xlu1 %968 }
 0xde4   :  { %v971_v43 = vmul.f32 %v969_v42, %v949_v35  ;;  %v1224_v42 = vld [vmem:[%s2208_s2] sm:$0xff] }
 0xde6   :  { %973 = vrot.lane.b32.xlu0 %v971_v43, %s1947_s9  ;;  %v1225_v43 = vld [vmem:[%s2208_s2 + $0x8] sm:$0xff]  ;;  %s335_s2 = scalar_lea.vmem [#allocation7], %s1574_s18 }
 0xde7   :  { %v979_v44 = vpop.permute.xlu1 %978  ;;  %v336_v51 = vld [vmem:[%s335_s2] sm:$0x1] }
 0xde8   :  { %981 = vst.msk [vmem:[#allocation3] sm:$0xff] %vm374_vm0, %v979_v44  ;;  %v1787_v44 = vpack.c.bf16 %v1225_v43, %v1224_v42  ;;  %338 = vst [vmem:[#allocation4 + $0x38] sm:$0x1] %v336_v51 }
 0xdef   :  { %v1070_v53 = vld [vmem:[#allocation3] sm:$0xff] }
 0xdf0   :  { %1072 = vrot.lane.b32.xlu1 %v1070_v53, %s1947_s9  ;;  %v347_v53 = vld [vmem:[%s346_s26] sm:$0x1] }
 0xdf1   :  { %348 = vst [vmem:[#allocation4 + $0x3a] sm:$0x1] %v347_v53 }
 0xe58   :  { %v974_v54 = vpop.permute.xlu0 %973 }
 0xe59   :  { %976 = vst.msk [vmem:[#allocation2] sm:$0xff] %vm374_vm0, %v974_v54  ;;  %v352_v54 = vld [vmem:[%s351_s27] sm:$0x1] }
 0xe5a   :  { %353 = vst [vmem:[#allocation4 + $0x3b] sm:$0x1] %v352_v54 }
 0xe60   :  { %v983_v55 = vld [vmem:[#allocation2] sm:$0xff] }
 0xe61   :  { %1709 = vmatmul.mubr.msk.f32.vlgmr.msra.gmra.mrb[4].mxu1 %vm374_vm0, %v983_v55  ;;  %v357_v55 = vld [vmem:[%s356_s28] sm:$0x1] }
 0xe62   :  { %1730 = vmatprep.mubr.msk.f32.mxu1 %vm1944_vm1, %v1945_v1  ;;  %v1073_v7 = vpop.permute.xlu1 %1072  ;;  %1788 = vmatpush3.bf16.msra.mxu1 %v1787_v44  ;;  %358 = vst [vmem:[#allocation4 + $0x3c] sm:$0x1] %v357_v55 }
 0xe63   :  { %1789 = vmatprep.subr.bf16.mxu1 %v1943_v0 }
 0xe66   :  { %1791 = vmatpush3.bf16.msra.mxu1 %v1790_v47 }
 0xf34   :  { %v1057_v57 = vpop.f32.mrb[4].mxu1 }
 0xf35   :  { %v1061_v58 = vadd.f32 %v1057_v57, %v982_v56  ;;  %v1710_v59 = vpop.f32.mrb[5].mxu1  ;;  %v362_v56 = vld [vmem:[%s361_s29] sm:$0x1] }
 0xf36   :  { %363 = vst [vmem:[#allocation4 + $0x3d] sm:$0x1] %v362_v56  ;;  %v367_v57 = vld [vmem:[%s366_s30] sm:$0x1] }
 0xf37   :  { %v1593_v60 = vmul.f32 -1.442695, %v1061_v58  ;;  %368 = vst [vmem:[#allocation4 + $0x3e] sm:$0x1] %v367_v57 }
 0xf39   :  { %1849 = vpow2.f32 %v1593_v60 }
 0xf3a   :  { %1851 = vtanh.f32 %v1061_v58  ;;  %v372_v58 = vld [vmem:[%s371_s6] sm:$0x1] }
 0xf3b   :  { %373 = vst [vmem:[#allocation4 + $0x3f] sm:$0x1] %v372_v58 }
 0xf43   :  { %v1850_v61 = vpop.eup %1849 }
 0xf44   :  { %v1066_v62 = vadd.f32 1.0, %v1850_v61  ;;  %v1852_v63 = vpop.eup %1851 }
 0xf46   :  { %1853 = vrcp.f32 %v1066_v62  ;;  %v1222_v62 = vld [vmem:[#allocation4 + $0x38] sm:$0xff] }
 0xf50   :  { %v1854_v2 = vpop.eup %1853 }
 0xf51   :  { %v1069_v3 = vsel %vm2042_vm4, %v1852_v63, %v1854_v2 }
 0xf52   :  { %1077 = vrot.lane.b32.xlu0 %v1069_v3, %s1946_s8  ;;  %v1075_v8 = vmul.f32 %v1073_v7, %v1069_v3 }
 0xfc4   :  { %v1078_v4 = vpop.permute.xlu0 %1077 }
 0xfc5   :  { %v1080_v6 = vmul.f32 %v1078_v4, %v1069_v3 }
 0xfc7   :  { %1082 = vrot.lane.b32.xlu0 %v1080_v6, %s1947_s9 }
0x1039   :  { %v1083_v9 = vpop.permute.xlu0 %1082 }
0x103a   :  { %v1085_v10 = vadd.f32 %v1083_v9, %v1075_v8 }
0x103c   :  { %1855 = vtanh.f32 %v1085_v10 }
0x1046   :  { %v1856_v12 = vpop.eup %1855 }
0x1047   :  { %1088 = vrot.lane.b32.xlu1 %v1856_v12, %s1946_s8 }
0x104b   :  { %1098 = vrot.lane.b32.xlu1 %v1085_v10, %s1948_s10 }
0x10b9   :  { %v1089_v13 = vpop.permute.xlu1 %1088 }
0x10ba   :  { %v1091_v14 = vmul.f32 %v1089_v13, %v1069_v3 }
0x10bc   :  { %1093 = vrot.lane.b32.xlu0 %v1091_v14, %s1947_s9 }
0x10bd   :  { %v1099_v15 = vpop.permute.xlu1 %1098 }
0x10be   :  { %1101 = vst.msk [vmem:[#allocation3] sm:$0xff] %vm374_vm0, %v1099_v15 }
0x10c5   :  { %v1190_v24 = vld [vmem:[#allocation3] sm:$0xff] }
0x10c6   :  { %1192 = vrot.lane.b32.xlu1 %v1190_v24, %s1947_s9 }
0x112e   :  { %v1094_v25 = vpop.permute.xlu0 %1093 }
0x112f   :  { %1096 = vst.msk [vmem:[#allocation2] sm:$0xff] %vm374_vm0, %v1094_v25 }
0x1136   :  { %v1103_v27 = vld [vmem:[#allocation2] sm:$0xff] }
0x1137   :  { %1720 = vmatmul.mubr.msk.f32.vlgmr.msra.gmra.mrb[6].mxu0 %vm374_vm0, %v1103_v27 }
0x1138   :  { %1741 = vmatprep.mubr.msk.f32.mxu0 %vm1944_vm1, %v1945_v1  ;;  %v1193_v1 = vpop.permute.xlu1 %1192  ;;  %1794 = vmatpush3.bf16.msra.mxu0 %v1793_v20 }
0x1139   :  { %1795 = vmatprep.subr.bf16.mxu0 %v1943_v0 }
0x113c   :  { %1797 = vmatpush3.bf16.msra.mxu0 %v1796_v23 }
0x120a   :  { %v1177_v29 = vpop.f32.mrb[6].mxu0 }
0x120b   :  { %v1181_v30 = vadd.f32 %v1177_v29, %v1102_v28  ;;  %v1721_v31 = vpop.f32.mrb[7].mxu0  ;;  %v1598_v29 = vld [vmem:[%s2210_s4] ss:$0 sm:$0xff]  ;;  %s1446_s4 = sshll.u32 %s1949_s3, 4  ;;  %s1447_s4 = int_to_ptr.vmem [resolvable:$true] %s1446_s4 }
0x120c   :  { %p1916_p0 = scmp.lt.s32.totalorder %s1447_s4, %s1447_s4 }
0x120d   :  { %v1595_v32 = vmul.f32 -1.442695, %v1181_v30 }
0x120f   :  { %1857 = vpow2.f32 %v1595_v32 }
0x1210   :  { %1859 = vtanh.f32 %v1181_v30 }
0x1219   :  { %v1858_v33 = vpop.eup %1857 }
0x121a   :  { %v1186_v5 = vadd.f32 1.0, %v1858_v33  ;;  %v1860_v34 = vpop.eup %1859 }
0x121c   :  { %1861 = vrcp.f32 %v1186_v5 }
0x1226   :  { %v1862_v35 = vpop.eup %1861 }
0x1227   :  { %v1189_v11 = vsel %vm2042_vm4, %v1860_v34, %v1862_v35 }
0x1228   :  { %1197 = vrot.lane.b32.xlu0 %v1189_v11, %s1946_s8  ;;  %v1195_v38 = vmul.f32 %v1193_v1, %v1189_v11 }
0x129a   :  { %v1198_v36 = vpop.permute.xlu0 %1197 }
0x129b   :  { %v1200_v37 = vmul.f32 %v1198_v36, %v1189_v11 }
0x129d   :  { %1202 = vrot.lane.b32.xlu0 %v1200_v37, %s1947_s9 }
0x130f   :  { %v1203_v39 = vpop.permute.xlu0 %1202 }
0x1310   :  { %v1205_v40 = vadd.f32 %v1203_v39, %v1195_v38 }
0x1312   :  { %1863 = vtanh.f32 %v1205_v40 }
0x131c   :  { %v1864_v41 = vpop.eup %1863 }
0x131d   :  { %1208 = vrot.lane.b32.xlu1 %v1864_v41, %s1946_s8 }
0x1321   :  { %1218 = vrot.lane.b32.xlu1 %v1205_v40, %s1948_s10 }
0x138f   :  { %v1209_v48 = vpop.permute.xlu1 %1208 }
0x1390   :  { %v1211_v49 = vmul.f32 %v1209_v48, %v1189_v11 }
0x1392   :  { %1213 = vrot.lane.b32.xlu0 %v1211_v49, %s1947_s9 }
0x1393   :  { %v1219_v50 = vpop.permute.xlu1 %1218 }
0x1394   :  { %1221 = vst.msk [vmem:[#allocation3] sm:$0xff] %vm374_vm0, %v1219_v50 }
0x139b   :  { %v1310_v59 = vld [vmem:[#allocation3] sm:$0xff] }
0x139c   :  { %1312 = vrot.lane.b32.xlu1 %v1310_v59, %s1947_s9 }
0x1404   :  { %v1214_v60 = vpop.permute.xlu0 %1213 }
0x1405   :  { %1216 = vst.msk [vmem:[#allocation2] sm:$0xff] %vm374_vm0, %v1214_v60 }
0x140c   :  { %v1223_v61 = vld [vmem:[#allocation2] sm:$0xff] }
0x140d   :  { %1731 = vmatmul.mubr.msk.f32.vlgmr.msra.gmra.mrb[6].mxu1 %vm374_vm0, %v1223_v61 }
0x140e   :  { %v1313_v14 = vpop.permute.xlu1 %1312 }
0x14e0   :  { %v1297_v63 = vpop.f32.mrb[6].mxu1 }
0x14e1   :  { %v1301_v2 = vadd.f32 %v1297_v63, %v1222_v62  ;;  %v1732_v3 = vpop.f32.mrb[7].mxu1 }
0x14e3   :  { %v1597_v4 = vmul.f32 -1.442695, %v1301_v2 }
0x14e5   :  { %1865 = vpow2.f32 %v1597_v4 }
0x14e6   :  { %1867 = vtanh.f32 %v1301_v2 }
0x14ef   :  { %v1866_v6 = vpop.eup %1865 }
0x14f0   :  { %v1306_v7 = vadd.f32 1.0, %v1866_v6  ;;  %v1868_v8 = vpop.eup %1867 }
0x14f2   :  { %1869 = vrcp.f32 %v1306_v7 }
0x14fc   :  { %v1870_v9 = vpop.eup %1869 }
0x14fd   :  { %v1309_v10 = vsel %vm2042_vm4, %v1868_v8, %v1870_v9 }
0x14fe   :  { %1317 = vrot.lane.b32.xlu0 %v1309_v10, %s1946_s8  ;;  %v1315_v15 = vmul.f32 %v1313_v14, %v1309_v10 }
0x1570   :  { %v1318_v12 = vpop.permute.xlu0 %1317 }
0x1571   :  { %v1320_v13 = vmul.f32 %v1318_v12, %v1309_v10 }
0x1573   :  { %1322 = vrot.lane.b32.xlu0 %v1320_v13, %s1947_s9 }
0x15e5   :  { %v1323_v16 = vpop.permute.xlu0 %1322 }
0x15e6   :  { %v1325_v17 = vadd.f32 %v1323_v16, %v1315_v15 }
0x15e8   :  { %1871 = vtanh.f32 %v1325_v17 }
0x15f2   :  { %v1872_v18 = vpop.eup %1871 }
0x15f3   :  { %1328 = vrot.lane.b32.xlu1 %v1872_v18, %s1946_s8 }
0x1665   :  { %v1329_v24 = vpop.permute.xlu1 %1328 }
0x1666   :  { %v1331_v25 = vmul.f32 %v1329_v24, %v1309_v10 }
0x1668   :  { %1333 = vrot.lane.b32.xlu0 %v1331_v25, %s1947_s9  ;;  %s1911_s9 = scalar_lea.vmem %s1447_s4, 128 }
0x1669   :  { %p1912_p13 = scmp.ne.s32.totalorder %s1447_s4, %s1911_s9  ;;  %p1917_p1 = scmp.lt.s32.totalorder %s1911_s9, %s1911_s9 }
0x166b   :  { %p1918_p2 = por %p1917_p1, %p1916_p0 }
0x166d   :  { %p1919_p3 = pnand %p1918_p2, %p1912_p13 }
0x16da   :  { %v1334_v27 = vpop.permute.xlu0 %1333 }
0x16db   :  { %1336 = vst.msk [vmem:[#allocation2] sm:$0xff] %vm374_vm0, %v1334_v27 }
0x16e2   :  { %v1342_v28 = vld [vmem:[#allocation2] sm:$0xff] }
0x16e3   :  { %1742 = vmatmul.mubr.msk.f32.vlgmr.msra.gmra.mrb[8].mxu0 %vm374_vm0, %v1342_v28 }
0x17b6   :  { %v1423_v30 = vpop.f32.mrb[8].mxu0 }
0x17b7   :  { %v1424_v31 = vadd.f32 %v1598_v29, %v1423_v30  ;;  %v1743_v32 = vpop.f32.mrb[9].mxu0 }
0x17b9   :  { %v1428_v0 = vsel %vm1427_vm5, %v1424_v31, -inf }
0x17ba   :  { %1429 = vmax.xlane.f32.xlu1 %v1428_v0 }
0x1847   :  { %v1430_v33 = vpop.xlane.xlu1 %1429 }
0x1848   :  { %v1431_v5 = vsub.f32 %v1424_v31, %v1430_v33 }
0x184a   :  { %v1432_v34 = vmul.f32 1.442695, %v1431_v5 }
0x184c   :  { %1873 = vpow2.f32 %v1432_v34 }
0x1856   :  { %v1874_v35 = vpop.eup %1873 }
0x1857   :  { %v1434_v11 = vsel %vm1427_vm5, %v1874_v35, 0.0 }
0x1858   :  { %1435 = vadd.xlane.f32.xlu0 %v1434_v11 }
0x186e   :  { %1338 = vrot.lane.b32.xlu0 %v1325_v17, %s1948_s10 }
0x18e5   :  { %v1436_v36 = vpop.xlane.xlu0 %1435 }
0x18e6   :  { %1875 = vrcp.f32 %v1436_v36 }
0x18e9   :  { %v1339_v37 = vpop.permute.xlu0 %1338 }
0x18ea   :  { %1341 = vst.msk [vmem:[#allocation3] sm:$0xff] %vm374_vm0, %v1339_v37 }
0x18f0   :  { %v1876_v1 = vpop.eup %1875 }
0x18f1   :  { %v1438_v38 = vmul.f32 %v1876_v1, %v1874_v35 }
0x18f3   :  { %1439 = vst.msk [vmem:[#allocation10] sm:$0xff] %vm1427_vm5, %v1438_v38 }
0x18f4   :  { %1922 = shalt.err (!%p1919_p3)
}
0x18f5   :  { %s1923_s19 = scalar_lea.hbm %s2211_s5, 128 }
0x18f6   :  { %p1924_p4 = scmp.ne.s32.totalorder %s2211_s5, %s1923_s19  ;;  %p1927_p5 = scmp.lt.u32.totalorder %s1923_s19, %s2211_s5 }
0x18f8   :  { %p1929_p6 = pnand %p1927_p5, %p1924_p4 }
0x18fa   :  { %1932 = shalt.err (!%p1929_p6)
}
0x18fb   :  { %1449 = dma.vmem_to_hbm [thread:$0]  %s1447_s4, 128, %s2211_s5, [#allocation9]  }
0x18fc   :  { %1937 = dma.done.wait [#allocation9], 128  }
0x18fd   :  { %1938 = vsyncadd [#allocation9], 4294967168 }
0x18fe   :  { %1453 = vsyncpa [#allocation8], 1 }
0x18ff   :  { %1454 = vsyncpa [#allocation9], 1 }

</bundles_post_ra>
